<compile_context>
chip_gen: v7x
topology: tpu7x:2x2x1
jax: 0.10.0
libtpu: 0.0.40
codegen_flags: <defaults>
</compile_context>

<pallas_src>
import math
import functools

import jax
import jax.numpy as jnp
from jax.experimental import pallas as pl
from jax.experimental.pallas import tpu as pltpu

EPS = 1e-12          # tutorial-style LayerNorm eps (custom LayerNorm, not nn.LayerNorm default)
MAX_ROW_TILE = 512   # row tile for the flattened (batch*seq) axis (mem-bound roofline ~85%)


def _row_tile(m):
    return m if m <= MAX_ROW_TILE else MAX_ROW_TILE


def _vmem_limit_bytes():
    # Per-generation VMEM budget: ~75% of physical capacity (v5e/v6e: 128 MiB -> 96 MiB,
    # v7x: 64 MiB -> 48 MiB), capped; falls back to a safe 64 MiB if the query is
    # unavailable at trace time.
    try:
        cap = pltpu.get_tpu_info().vmem_capacity_bytes
        return int(min(cap * 3 // 4, 100 * 1024 * 1024))
    except Exception:
        return 64 * 1024 * 1024


def _compiler_params(*semantics):
    return pltpu.CompilerParams(
        dimension_semantics=tuple(semantics),
        vmem_limit_bytes=_vmem_limit_bytes(),
    )


# ----------------------------------------------------------------------------
# Kernel: fully fused multi-head-attention block, grid = (batch,)
#   LayerNorm( (softmax(mask(QK^T/sqrt(dk))) V) @ Wo + bo + residual )
# ----------------------------------------------------------------------------

def _mha_block_kernel(xq_ref, xkv_ref, m_ref, wq_ref, bq_ref, wkv_ref, bkv_ref,
                      wo_ref, bo_ref, g_ref, bb_ref, o_ref, *, n_head, scale, eps):
    xq = xq_ref[...]                                    # (Sq, D) f32 (residual)
    xkv = xkv_ref[...]                                  # (Sk, D) f32
    mask_ok = m_ref[...].astype(jnp.float32) > 0.0      # (Sq, Sk), int8 -> bool

    # Q / fused-KV projections (bf16 MXU operands, f32 accumulation).
    q = jnp.dot(xq.astype(jnp.bfloat16), wq_ref[...],
                preferred_element_type=jnp.float32) + bq_ref[...]        # (Sq, D)
    kv = jnp.dot(xkv.astype(jnp.bfloat16), wkv_ref[...],
                 preferred_element_type=jnp.float32) + bkv_ref[...]      # (Sk, 2D)

    D = q.shape[-1]
    dk = D // n_head
    # TODO(synk): for long Sk switch to an online-softmax (flash) loop over Sk tiles,
    # and add an Sq row-tile grid axis; at toy/moderate sizes the full (Sq, Sk) score
    # matrix per head fits in vregs/VMEM.
    heads = []
    for h in range(n_head):                              # static unroll over heads
        qh = q[:, h * dk:(h + 1) * dk].astype(jnp.bfloat16)
        kh = kv[:, h * dk:(h + 1) * dk].astype(jnp.bfloat16)
        vh = kv[:, D + h * dk:D + (h + 1) * dk].astype(jnp.bfloat16)
        # trans-B contraction: MXU consumes K directly, no k.T materialized.
        s = jax.lax.dot_general(qh, kh, (((1,), (1,)), ((), ())),
                                preferred_element_type=jnp.float32) * scale
        s = jnp.where(mask_ok, s, -1e9)                  # masked_fill(mask == 0, -1e9)
        s = s - jnp.max(s, axis=-1, keepdims=True)
        p = jnp.exp(s)
        p = p * pl.reciprocal(jnp.sum(p, axis=-1, keepdims=True), approx=True)
        heads.append(jnp.dot(p.astype(jnp.bfloat16), vh,
                             preferred_element_type=jnp.float32))
    attn = jnp.concatenate(heads, axis=-1)               # (Sq, D), lane-dense in vregs

    # Output projection + residual + LayerNorm (fused epilogue, single dense store).
    y = jnp.dot(attn.astype(jnp.bfloat16), wo_ref[...],
                preferred_element_type=jnp.float32) + bo_ref[...]
    y = y + xq                                           # dropout is identity (eval)
    mu = jnp.mean(y, axis=-1, keepdims=True)
    var = jnp.mean(jnp.square(y - mu), axis=-1, keepdims=True)
    o_ref[...] = ((y - mu) * jax.lax.rsqrt(var + eps) * g_ref[...]
                  + bb_ref[...]).astype(o_ref.dtype)


def mha_block(xq, xkv, mask_i8, p, *, n_head):
    """LayerNorm(MultiHeadAttention(xq, xkv, xkv, mask) + xq), fully fused.

    xq: (B, Sq, D) f32, xkv: (B, Sk, D) f32, mask_i8: (B, Sq, Sk) int8.
    """
    B, Sq, D = xq.shape
    Sk = xkv.shape[1]
    dk = D // n_head
    kernel = functools.partial(_mha_block_kernel, n_head=n_head,
                               scale=1.0 / math.sqrt(dk), eps=EPS)
    # TODO(synk): when supported/stable, mark the constant-index weight specs with
    # pipeline_mode=pl.Buffered(1) to avoid double-buffering resident weights (v7x VMEM).
    return pl.pallas_call(
        kernel,
        out_shape=jax.ShapeDtypeStruct((B, Sq, D), jnp.float32),
        grid=(B,),
        in_specs=[
            pl.BlockSpec((None, Sq, D), lambda b: (b, 0, 0)),       # xq (residual)
            pl.BlockSpec((None, Sk, D), lambda b: (b, 0, 0)),       # xkv
            pl.BlockSpec((None, Sq, Sk), lambda b: (b, 0, 0)),      # mask (int8, shared across heads)
            pl.BlockSpec((D, D), lambda b: (0, 0)),                 # Wq  (resident)
            pl.BlockSpec((1, D), lambda b: (0, 0)),
            pl.BlockSpec((D, 2 * D), lambda b: (0, 0)),             # Wkv (resident)
            pl.BlockSpec((1, 2 * D), lambda b: (0, 0)),
            pl.BlockSpec((D, D), lambda b: (0, 0)),                 # Wo  (resident)
            pl.BlockSpec((1, D), lambda b: (0, 0)),
            pl.BlockSpec((1, D), lambda b: (0, 0)),                 # LN gamma
            pl.BlockSpec((1, D), lambda b: (0, 0)),                 # LN beta
        ],
        out_specs=pl.BlockSpec((None, Sq, D), lambda b: (b, 0, 0)),
        compiler_params=_compiler_params("parallel"),
    )(xq, xkv, mask_i8,
      p["wq"], p["bq"].reshape(1, D),
      p["w_kv"], p["b_kv"].reshape(1, 2 * D),
      p["wo"], p["bo"].reshape(1, D),
      p["ln_g"].reshape(1, D), p["ln_b"].reshape(1, D))


# ----------------------------------------------------------------------------
# Kernel: fused FFN  relu(x@W1+b1)@W2+b2 + residual -> LayerNorm
# ----------------------------------------------------------------------------

def _ffn_residual_ln_kernel(x_ref, w1_ref, b1_ref, w2_ref, b2_ref,
                            g_ref, bb_ref, o_ref, *, eps):
    x = x_ref[...]
    h = jnp.dot(x.astype(jnp.bfloat16), w1_ref[...],
                preferred_element_type=jnp.float32) + b1_ref[...]
    h = jnp.maximum(h, 0.0)
    y = jnp.dot(h.astype(jnp.bfloat16), w2_ref[...],
                preferred_element_type=jnp.float32) + b2_ref[...]
    y = y + x                                            # dropout is identity (eval)
    mu = jnp.mean(y, axis=-1, keepdims=True)
    var = jnp.mean(jnp.square(y - mu), axis=-1, keepdims=True)
    o_ref[...] = ((y - mu) * jax.lax.rsqrt(var + eps) * g_ref[...]
                  + bb_ref[...]).astype(o_ref.dtype)


def ffn_residual_layernorm(x, w1, b1, w2, b2, gamma, beta):
    """LayerNorm(FFN(x) + x); x: (M, D) f32, w1: (D,H) bf16, w2: (H,D) bf16."""
    M, D = x.shape
    H = w1.shape[1]
    tm = _row_tile(M)
    # TODO(synk): for large d_model/hidden on v7x (64 MiB VMEM) add a hidden-axis grid
    # ("arbitrary") with a (tm, D) f32 VMEM accumulator + pl.when init/finalize so only
    # W1[:, h_tile] / W2[h_tile, :] are resident per step.
    return pl.pallas_call(
        functools.partial(_ffn_residual_ln_kernel, eps=EPS),
        out_shape=jax.ShapeDtypeStruct((M, D), jnp.float32),
        grid=(pl.cdiv(M, tm),),
        in_specs=[
            pl.BlockSpec((tm, D), lambda i: (i, 0)),
            pl.BlockSpec((D, H), lambda i: (0, 0)),      # weights resident across row tiles
            pl.BlockSpec((1, H), lambda i: (0, 0)),
            pl.BlockSpec((H, D), lambda i: (0, 0)),
            pl.BlockSpec((1, D), lambda i: (0, 0)),
            pl.BlockSpec((1, D), lambda i: (0, 0)),
            pl.BlockSpec((1, D), lambda i: (0, 0)),
        ],
        out_specs=pl.BlockSpec((tm, D), lambda i: (i, 0)),
        compiler_params=_compiler_params("parallel"),
    )(x, w1, b1.reshape(1, H), w2, b2.reshape(1, D),
      gamma.reshape(1, D), beta.reshape(1, D))


# ----------------------------------------------------------------------------
# Model glue (plain JAX): mask prep + layer composition
# ----------------------------------------------------------------------------

def _prep_mask(mask, B, Sq, Sk):
    """PyTorch-style (B,1,Sq,Sk) or (B,1,1,Sk) mask -> (B, Sq, Sk) int8 (4x less DMA)."""
    # TODO(synk): generate the causal part in-kernel (broadcasted_iota) and pass padding
    # lengths via scalar prefetch for zero mask traffic on long sequences.
    m = jnp.broadcast_to(mask, (B, 1, Sq, Sk)).reshape(B, Sq, Sk)
    return (m != 0).astype(jnp.int8)


def decoder_layer_forward(params, decoder, encoder, t_mask, s_mask, *, n_head):
    B, Sq, D = decoder.shape
    Sk = encoder.shape[1]
    # self-attention + add&norm (one fused kernel)
    x = mha_block(decoder, decoder, _prep_mask(t_mask, B, Sq, Sq),
                  params["self_attn"], n_head=n_head)
    # cross-attention + add&norm (one fused kernel)
    x = mha_block(x, encoder, _prep_mask(s_mask, B, Sq, Sk),
                  params["cross_attn"], n_head=n_head)
    # position-wise FFN + add&norm (one fused kernel)
    y = ffn_residual_layernorm(x.reshape(B * Sq, D),
                               params["ffn_w1"], params["ffn_b1"],
                               params["ffn_w2"], params["ffn_b2"],
                               params["ln3_g"], params["ln3_b"])
    return y.reshape(B, Sq, D)


# ----------------------------------------------------------------------------
# Deterministic parameter init (nn.Linear-style uniform; weights stored bf16)
# ----------------------------------------------------------------------------

def _init_linear(key, fan_in, fan_out):
    kw, kb = jax.random.split(key)
    bound = 1.0 / math.sqrt(fan_in)
    w = jax.random.uniform(kw, (fan_in, fan_out), jnp.float32, -bound, bound)
    b = jax.random.uniform(kb, (fan_out,), jnp.float32, -bound, bound)
    return w.astype(jnp.bfloat16), b       # bf16 MXU operands, f32 bias


def _init_attn_params(keys, d_model):
    wq, bq = _init_linear(keys[0], d_model, d_model)
    wk, bk = _init_linear(keys[1], d_model, d_model)
    wv, bv = _init_linear(keys[2], d_model, d_model)
    wo, bo = _init_linear(keys[3], d_model, d_model)
    return {
        "wq": wq, "bq": bq,
        "w_kv": jnp.concatenate([wk, wv], axis=1),     # (D, 2D) fused KV projection
        "b_kv": jnp.concatenate([bk, bv], axis=0),     # (2D,)
        "wo": wo, "bo": bo,
        "ln_g": jnp.ones((d_model,), jnp.float32),
        "ln_b": jnp.zeros((d_model,), jnp.float32),
    }


def init_params(key, *, d_model, n_head, hidden_dim):
    k = jax.random.split(key, 10)
    self_attn = _init_attn_params(k[0:4], d_model)
    cross_attn = _init_attn_params(k[4:8], d_model)
    w1, b1 = _init_linear(k[8], d_model, hidden_dim)
    w2, b2 = _init_linear(k[9], hidden_dim, d_model)
    return {
        "self_attn": self_attn,
        "cross_attn": cross_attn,
        "ffn_w1": w1, "ffn_b1": b1, "ffn_w2": w2, "ffn_b2": b2,
        "ln3_g": jnp.ones((d_model,), jnp.float32),
        "ln3_b": jnp.zeros((d_model,), jnp.float32),
    }


# ----------------------------------------------------------------------------
# Main
# ----------------------------------------------------------------------------

if __name__ == "__main__":
    B, S_dec, S_enc = 2, 8, 8
    d_model, hidden_dim, n_head = 32, 64, 4

    key = jax.random.PRNGKey(0)
    k_par, k_dec, k_enc = jax.random.split(key, 3)

    params = init_params(k_par, d_model=d_model, n_head=n_head, hidden_dim=hidden_dim)

    decoder = jax.random.normal(k_dec, (B, S_dec, d_model), jnp.float32)  # decoder input
    encoder = jax.random.normal(k_enc, (B, S_enc, d_model), jnp.float32)  # encoder output

    # t_mask: causal lower-triangular (B, 1, S_dec, S_dec); s_mask: no padding (B, 1, 1, S_enc)
    t_mask = jnp.tril(jnp.ones((S_dec, S_dec), jnp.float32))[None, None, :, :]
    t_mask = jnp.broadcast_to(t_mask, (B, 1, S_dec, S_dec))
    s_mask = jnp.ones((B, 1, 1, S_enc), jnp.float32)

    fwd = jax.jit(functools.partial(decoder_layer_forward, n_head=n_head))
    out = fwd(params, decoder, encoder, t_mask, s_mask)
    out = jax.block_until_ready(out)

    assert out.shape == (B, S_dec, d_model), out.shape
    assert jnp.all(jnp.isfinite(out))
    print("KERNEL_OK")
</pallas_src>

<mosaic_0001>
module attributes {stable_mosaic.version = 11 : i64} {
  func.func @_ffn_residual_ln_kernel(%arg0: i32, %arg1: memref<16x32xf32, #tpu.memory_space<vmem>>, %arg2: memref<32x64xbf16, #tpu.memory_space<vmem>>, %arg3: memref<1x64xf32, #tpu.memory_space<vmem>>, %arg4: memref<64x32xbf16, #tpu.memory_space<vmem>>, %arg5: memref<1x32xf32, #tpu.memory_space<vmem>>, %arg6: memref<1x32xf32, #tpu.memory_space<vmem>>, %arg7: memref<1x32xf32, #tpu.memory_space<vmem>>, %arg8: memref<16x32xf32, #tpu.memory_space<vmem>>) attributes {dimension_semantics = [#tpu.dimension_semantics<parallel>], iteration_bounds = array<i64: 1>, scalar_prefetch = 0 : i64, scratch_operands = 0 : i64, tpu.core_type = #tpu.core_type<tc>, window_params = [{transform_indices = @transform_0, window_bounds = array<i64: 16, 32>}, {pipeline_mode = #tpu.pipeline_mode<synchronous>, transform_indices = @transform_1, window_bounds = array<i64: 32, 64>}, {pipeline_mode = #tpu.pipeline_mode<synchronous>, transform_indices = @transform_2, window_bounds = array<i64: 1, 64>}, {pipeline_mode = #tpu.pipeline_mode<synchronous>, transform_indices = @transform_3, window_bounds = array<i64: 64, 32>}, {pipeline_mode = #tpu.pipeline_mode<synchronous>, transform_indices = @transform_4, window_bounds = array<i64: 1, 32>}, {pipeline_mode = #tpu.pipeline_mode<synchronous>, transform_indices = @transform_5, window_bounds = array<i64: 1, 32>}, {pipeline_mode = #tpu.pipeline_mode<synchronous>, transform_indices = @transform_6, window_bounds = array<i64: 1, 32>}, {transform_indices = @transform_7, window_bounds = array<i64: 16, 32>}]} {
    %c0 = arith.constant 0 : index
    %c0_0 = arith.constant 0 : index
    %0 = vector.load %arg1[%c0, %c0_0] : memref<16x32xf32, #tpu.memory_space<vmem>>, vector<16x32xf32>
    %1 = arith.truncf %0 : vector<16x32xf32> to vector<16x32xbf16>
    %c0_1 = arith.constant 0 : index
    %c0_2 = arith.constant 0 : index
    %2 = vector.load %arg2[%c0_1, %c0_2] : memref<32x64xbf16, #tpu.memory_space<vmem>>, vector<32x64xbf16>
    %cst = arith.constant dense<0.000000e+00> : vector<16x64xf32>
    %3 = tpu.matmul %1, %2, %cst {dimension_numbers = #tpu.dot_dimension_numbers<[1], [0], [0], [1], [0, 0, 1, 1], [], []>} : vector<16x32xbf16>, vector<32x64xbf16>, vector<16x64xf32> -> vector<16x64xf32>
    %c0_3 = arith.constant 0 : index
    %c0_4 = arith.constant 0 : index
    %4 = vector.load %arg3[%c0_3, %c0_4] : memref<1x64xf32, #tpu.memory_space<vmem>>, vector<1x64xf32>
    %5 = vector.broadcast %4 : vector<1x64xf32> to vector<16x64xf32>
    %6 = arith.addf %3, %5 : vector<16x64xf32>
    %cst_5 = arith.constant 0.000000e+00 : f32
    %7 = vector.broadcast %cst_5 : f32 to vector<16x64xf32>
    %8 = arith.maximumf %6, %7 : vector<16x64xf32>
    %9 = arith.truncf %8 : vector<16x64xf32> to vector<16x64xbf16>
    %c0_6 = arith.constant 0 : index
    %c0_7 = arith.constant 0 : index
    %10 = vector.load %arg4[%c0_6, %c0_7] : memref<64x32xbf16, #tpu.memory_space<vmem>>, vector<64x32xbf16>
    %cst_8 = arith.constant dense<0.000000e+00> : vector<16x32xf32>
    %11 = tpu.matmul %9, %10, %cst_8 {dimension_numbers = #tpu.dot_dimension_numbers<[1], [0], [0], [1], [0, 0, 1, 1], [], []>} : vector<16x64xbf16>, vector<64x32xbf16>, vector<16x32xf32> -> vector<16x32xf32>
    %c0_9 = arith.constant 0 : index
    %c0_10 = arith.constant 0 : index
    %12 = vector.load %arg5[%c0_9, %c0_10] : memref<1x32xf32, #tpu.memory_space<vmem>>, vector<1x32xf32>
    %13 = vector.broadcast %12 : vector<1x32xf32> to vector<16x32xf32>
    %14 = arith.addf %11, %13 : vector<16x32xf32>
    %15 = arith.addf %14, %0 : vector<16x32xf32>
    %cst_11 = arith.constant dense<0.000000e+00> : vector<16xf32>
    %16 = vector.multi_reduction <add>, %15, %cst_11 [1] : vector<16x32xf32> to vector<16xf32>
    %17 = vector.shape_cast %16 : vector<16xf32> to vector<16x1xf32>
    %cst_12 = arith.constant 3.200000e+01 : f32
    %18 = vector.broadcast %cst_12 : f32 to vector<16x1xf32>
    %19 = arith.divf %17, %18 : vector<16x1xf32>
    %20 = vector.broadcast %19 : vector<16x1xf32> to vector<16x32xf32>
    %21 = arith.subf %15, %20 : vector<16x32xf32>
    %22 = arith.mulf %21, %21 : vector<16x32xf32>
    %cst_13 = arith.constant dense<0.000000e+00> : vector<16xf32>
    %23 = vector.multi_reduction <add>, %22, %cst_13 [1] : vector<16x32xf32> to vector<16xf32>
    %24 = vector.shape_cast %23 : vector<16xf32> to vector<16x1xf32>
    %cst_14 = arith.constant 3.200000e+01 : f32
    %25 = vector.broadcast %cst_14 : f32 to vector<16x1xf32>
    %26 = arith.divf %24, %25 : vector<16x1xf32>
    %27 = vector.broadcast %19 : vector<16x1xf32> to vector<16x32xf32>
    %28 = arith.subf %15, %27 : vector<16x32xf32>
    %cst_15 = arith.constant 9.99999996E-13 : f32
    %29 = vector.broadcast %cst_15 : f32 to vector<16x1xf32>
    %30 = arith.addf %26, %29 : vector<16x1xf32>
    %31 = math.rsqrt %30 : vector<16x1xf32>
    %32 = vector.broadcast %31 : vector<16x1xf32> to vector<16x32xf32>
    %33 = arith.mulf %28, %32 : vector<16x32xf32>
    %c0_16 = arith.constant 0 : index
    %c0_17 = arith.constant 0 : index
    %34 = vector.load %arg6[%c0_16, %c0_17] : memref<1x32xf32, #tpu.memory_space<vmem>>, vector<1x32xf32>
    %35 = vector.broadcast %34 : vector<1x32xf32> to vector<16x32xf32>
    %36 = arith.mulf %33, %35 : vector<16x32xf32>
    %c0_18 = arith.constant 0 : index
    %c0_19 = arith.constant 0 : index
    %37 = vector.load %arg7[%c0_18, %c0_19] : memref<1x32xf32, #tpu.memory_space<vmem>>, vector<1x32xf32>
    %38 = vector.broadcast %37 : vector<1x32xf32> to vector<16x32xf32>
    %39 = arith.addf %36, %38 : vector<16x32xf32>
    %c0_20 = arith.constant 0 : index
    %c0_21 = arith.constant 0 : index
    %40 = vector.load %arg8[%c0_20, %c0_21] : memref<16x32xf32, #tpu.memory_space<vmem>>, vector<16x32xf32>
    tpu.vector_store %arg8[%c0_20, %c0_21], %39 {strides = array<i32>} : memref<16x32xf32, #tpu.memory_space<vmem>>, vector<16x32xf32>,
    return
  }
  func.func @transform_0(%arg0: i32) -> (i32, i32) {
    %c0_i32 = arith.constant 0 : i32
    %c0_i32_0 = arith.constant 0 : i32
    return %arg0, %c0_i32 : i32, i32
  }
  func.func @transform_1(%arg0: i32) -> (i32, i32) {
    %c0_i32 = arith.constant 0 : i32
    %c0_i32_0 = arith.constant 0 : i32
    %c0_i32_1 = arith.constant 0 : i32
    return %c0_i32, %c0_i32_0 : i32, i32
  }
  func.func @transform_2(%arg0: i32) -> (i32, i32) {
    %c0_i32 = arith.constant 0 : i32
    %c0_i32_0 = arith.constant 0 : i32
    %c0_i32_1 = arith.constant 0 : i32
    return %c0_i32, %c0_i32_0 : i32, i32
  }
  func.func @transform_3(%arg0: i32) -> (i32, i32) {
    %c0_i32 = arith.constant 0 : i32
    %c0_i32_0 = arith.constant 0 : i32
    %c0_i32_1 = arith.constant 0 : i32
    return %c0_i32, %c0_i32_0 : i32, i32
  }
  func.func @transform_4(%arg0: i32) -> (i32, i32) {
    %c0_i32 = arith.constant 0 : i32
    %c0_i32_0 = arith.constant 0 : i32
    %c0_i32_1 = arith.constant 0 : i32
    return %c0_i32, %c0_i32_0 : i32, i32
  }
  func.func @transform_5(%arg0: i32) -> (i32, i32) {
    %c0_i32 = arith.constant 0 : i32
    %c0_i32_0 = arith.constant 0 : i32
    %c0_i32_1 = arith.constant 0 : i32
    return %c0_i32, %c0_i32_0 : i32, i32
  }
  func.func @transform_6(%arg0: i32) -> (i32, i32) {
    %c0_i32 = arith.constant 0 : i32
    %c0_i32_0 = arith.constant 0 : i32
    %c0_i32_1 = arith.constant 0 : i32
    return %c0_i32, %c0_i32_0 : i32, i32
  }
  func.func @transform_7(%arg0: i32) -> (i32, i32) {
    %c0_i32 = arith.constant 0 : i32
    %c0_i32_0 = arith.constant 0 : i32
    return %arg0, %c0_i32 : i32, i32
  }
}

module attributes {stable_mosaic.version = 11 : i64} {
  func.func @_mha_block_kernel(%arg0: i32, %arg1: memref<1x8x32xf32, #tpu.memory_space<vmem>>, %arg2: memref<1x8x32xf32, #tpu.memory_space<vmem>>, %arg3: memref<1x8x8xi8, #tpu.memory_space<vmem>>, %arg4: memref<32x32xbf16, #tpu.memory_space<vmem>>, %arg5: memref<1x32xf32, #tpu.memory_space<vmem>>, %arg6: memref<32x64xbf16, #tpu.memory_space<vmem>>, %arg7: memref<1x64xf32, #tpu.memory_space<vmem>>, %arg8: memref<32x32xbf16, #tpu.memory_space<vmem>>, %arg9: memref<1x32xf32, #tpu.memory_space<vmem>>, %arg10: memref<1x32xf32, #tpu.memory_space<vmem>>, %arg11: memref<1x32xf32, #tpu.memory_space<vmem>>, %arg12: memref<1x8x32xf32, #tpu.memory_space<vmem>>) attributes {dimension_semantics = [#tpu.dimension_semantics<parallel>], iteration_bounds = array<i64: 2>, scalar_prefetch = 0 : i64, scratch_operands = 0 : i64, tpu.core_type = #tpu.core_type<tc>, window_params = [{transform_indices = @transform_0, window_bounds = array<i64: 1, 8, 32>}, {transform_indices = @transform_1, window_bounds = array<i64: 1, 8, 32>}, {transform_indices = @transform_2, window_bounds = array<i64: 1, 8, 8>}, {pipeline_mode = #tpu.pipeline_mode<synchronous>, transform_indices = @transform_3, window_bounds = array<i64: 32, 32>}, {pipeline_mode = #tpu.pipeline_mode<synchronous>, transform_indices = @transform_4, window_bounds = array<i64: 1, 32>}, {pipeline_mode = #tpu.pipeline_mode<synchronous>, transform_indices = @transform_5, window_bounds = array<i64: 32, 64>}, {pipeline_mode = #tpu.pipeline_mode<synchronous>, transform_indices = @transform_6, window_bounds = array<i64: 1, 64>}, {pipeline_mode = #tpu.pipeline_mode<synchronous>, transform_indices = @transform_7, window_bounds = array<i64: 32, 32>}, {pipeline_mode = #tpu.pipeline_mode<synchronous>, transform_indices = @transform_8, window_bounds = array<i64: 1, 32>}, {pipeline_mode = #tpu.pipeline_mode<synchronous>, transform_indices = @transform_9, window_bounds = array<i64: 1, 32>}, {pipeline_mode = #tpu.pipeline_mode<synchronous>, transform_indices = @transform_10, window_bounds = array<i64: 1, 32>}, {transform_indices = @transform_11, window_bounds = array<i64: 1, 8, 32>}]} {
    %c0 = arith.constant 0 : index
    %c0_0 = arith.constant 0 : index
    %c0_1 = arith.constant 0 : index
    %0 = vector.load %arg1[%c0, %c0_0, %c0_1] : memref<1x8x32xf32, #tpu.memory_space<vmem>>, vector<1x8x32xf32>
    %1 = vector.shape_cast %0 : vector<1x8x32xf32> to vector<8x32xf32>
    %c0_2 = arith.constant 0 : index
    %c0_3 = arith.constant 0 : index
    %c0_4 = arith.constant 0 : index
    %2 = vector.load %arg2[%c0_2, %c0_3, %c0_4] : memref<1x8x32xf32, #tpu.memory_space<vmem>>, vector<1x8x32xf32>
    %3 = vector.shape_cast %2 : vector<1x8x32xf32> to vector<8x32xf32>
    %c0_5 = arith.constant 0 : index
    %c0_6 = arith.constant 0 : index
    %c0_7 = arith.constant 0 : index
    %4 = vector.load %arg3[%c0_5, %c0_6, %c0_7] : memref<1x8x8xi8, #tpu.memory_space<vmem>>, vector<1x8x8xi8>
    %5 = vector.shape_cast %4 : vector<1x8x8xi8> to vector<8x8xi8>
    %6 = arith.sitofp %5 : vector<8x8xi8> to vector<8x8xf32>
    %cst = arith.constant 0.000000e+00 : f32
    %7 = vector.broadcast %cst : f32 to vector<8x8xf32>
    %8 = arith.cmpf ogt, %6, %7 : vector<8x8xf32>
    %9 = arith.truncf %1 : vector<8x32xf32> to vector<8x32xbf16>
    %c0_8 = arith.constant 0 : index
    %c0_9 = arith.constant 0 : index
    %10 = vector.load %arg4[%c0_8, %c0_9] : memref<32x32xbf16, #tpu.memory_space<vmem>>, vector<32x32xbf16>
    %cst_10 = arith.constant dense<0.000000e+00> : vector<8x32xf32>
    %11 = tpu.matmul %9, %10, %cst_10 {dimension_numbers = #tpu.dot_dimension_numbers<[1], [0], [0], [1], [0, 0, 1, 1], [], []>} : vector<8x32xbf16>, vector<32x32xbf16>, vector<8x32xf32> -> vector<8x32xf32>
    %c0_11 = arith.constant 0 : index
    %c0_12 = arith.constant 0 : index
    %12 = vector.load %arg5[%c0_11, %c0_12] : memref<1x32xf32, #tpu.memory_space<vmem>>, vector<1x32xf32>
    %13 = vector.broadcast %12 : vector<1x32xf32> to vector<8x32xf32>
    %14 = arith.addf %11, %13 : vector<8x32xf32>
    %15 = arith.truncf %3 : vector<8x32xf32> to vector<8x32xbf16>
    %c0_13 = arith.constant 0 : index
    %c0_14 = arith.constant 0 : index
    %16 = vector.load %arg6[%c0_13, %c0_14] : memref<32x64xbf16, #tpu.memory_space<vmem>>, vector<32x64xbf16>
    %cst_15 = arith.constant dense<0.000000e+00> : vector<8x64xf32>
    %17 = tpu.matmul %15, %16, %cst_15 {dimension_numbers = #tpu.dot_dimension_numbers<[1], [0], [0], [1], [0, 0, 1, 1], [], []>} : vector<8x32xbf16>, vector<32x64xbf16>, vector<8x64xf32> -> vector<8x64xf32>
    %c0_16 = arith.constant 0 : index
    %c0_17 = arith.constant 0 : index
    %18 = vector.load %arg7[%c0_16, %c0_17] : memref<1x64xf32, #tpu.memory_space<vmem>>, vector<1x64xf32>
    %19 = vector.broadcast %18 : vector<1x64xf32> to vector<8x64xf32>
    %20 = arith.addf %17, %19 : vector<8x64xf32>
    %21 = vector.extract_strided_slice %14 {offsets = [0, 0], sizes = [8, 8], strides = [1, 1]} : vector<8x32xf32> to vector<8x8xf32>
    %22 = arith.truncf %21 : vector<8x8xf32> to vector<8x8xbf16>
    %23 = vector.extract_strided_slice %20 {offsets = [0, 0], sizes = [8, 8], strides = [1, 1]} : vector<8x64xf32> to vector<8x8xf32>
    %24 = arith.truncf %23 : vector<8x8xf32> to vector<8x8xbf16>
    %25 = vector.extract_strided_slice %20 {offsets = [0, 32], sizes = [8, 8], strides = [1, 1]} : vector<8x64xf32> to vector<8x8xf32>
    %26 = arith.truncf %25 : vector<8x8xf32> to vector<8x8xbf16>
    %cst_18 = arith.constant dense<0.000000e+00> : vector<8x8xf32>
    %27 = tpu.matmul %22, %24, %cst_18 {dimension_numbers = #tpu.dot_dimension_numbers<[1], [1], [0], [0], [0, 0, 1, 0], [], []>} : vector<8x8xbf16>, vector<8x8xbf16>, vector<8x8xf32> -> vector<8x8xf32>
    %cst_19 = arith.constant 0.353553385 : f32
    %28 = vector.broadcast %cst_19 : f32 to vector<8x8xf32>
    %29 = arith.mulf %27, %28 : vector<8x8xf32>
    %cst_20 = arith.constant -1.000000e+09 : f32
    %30 = vector.broadcast %cst_20 : f32 to vector<8x8xf32>
    %31 = arith.select %8, %29, %30 : vector<8x8xi1>, vector<8x8xf32>
    %cst_21 = arith.constant dense<0xFF800000> : vector<8xf32>
    %32 = vector.multi_reduction <maximumf>, %31, %cst_21 [1] : vector<8x8xf32> to vector<8xf32>
    %33 = vector.shape_cast %32 : vector<8xf32> to vector<8x1xf32>
    %34 = vector.broadcast %33 : vector<8x1xf32> to vector<8x8xf32>
    %35 = arith.subf %31, %34 : vector<8x8xf32>
    %36 = math.exp %35 : vector<8x8xf32>
    %cst_22 = arith.constant dense<0.000000e+00> : vector<8xf32>
    %37 = vector.multi_reduction <add>, %36, %cst_22 [1] : vector<8x8xf32> to vector<8xf32>
    %38 = vector.shape_cast %37 : vector<8xf32> to vector<8x1xf32>
    %39 = tpu.reciprocal %38 {approx = true} : vector<8x1xf32> -> vector<8x1xf32>
    %40 = vector.broadcast %39 : vector<8x1xf32> to vector<8x8xf32>
    %41 = arith.mulf %36, %40 : vector<8x8xf32>
    %42 = arith.truncf %41 : vector<8x8xf32> to vector<8x8xbf16>
    %cst_23 = arith.constant dense<0.000000e+00> : vector<8x8xf32>
    %43 = tpu.matmul %42, %26, %cst_23 {dimension_numbers = #tpu.dot_dimension_numbers<[1], [0], [0], [1], [0, 0, 1, 1], [], []>} : vector<8x8xbf16>, vector<8x8xbf16>, vector<8x8xf32> -> vector<8x8xf32>
    %44 = vector.extract_strided_slice %14 {offsets = [0, 8], sizes = [8, 8], strides = [1, 1]} : vector<8x32xf32> to vector<8x8xf32>
    %45 = arith.truncf %44 : vector<8x8xf32> to vector<8x8xbf16>
    %46 = vector.extract_strided_slice %20 {offsets = [0, 8], sizes = [8, 8], strides = [1, 1]} : vector<8x64xf32> to vector<8x8xf32>
    %47 = arith.truncf %46 : vector<8x8xf32> to vector<8x8xbf16>
    %48 = vector.extract_strided_slice %20 {offsets = [0, 40], sizes = [8, 8], strides = [1, 1]} : vector<8x64xf32> to vector<8x8xf32>
    %49 = arith.truncf %48 : vector<8x8xf32> to vector<8x8xbf16>
    %cst_24 = arith.constant dense<0.000000e+00> : vector<8x8xf32>
    %50 = tpu.matmul %45, %47, %cst_24 {dimension_numbers = #tpu.dot_dimension_numbers<[1], [1], [0], [0], [0, 0, 1, 0], [], []>} : vector<8x8xbf16>, vector<8x8xbf16>, vector<8x8xf32> -> vector<8x8xf32>
    %cst_25 = arith.constant 0.353553385 : f32
    %51 = vector.broadcast %cst_25 : f32 to vector<8x8xf32>
    %52 = arith.mulf %50, %51 : vector<8x8xf32>
    %cst_26 = arith.constant -1.000000e+09 : f32
    %53 = vector.broadcast %cst_26 : f32 to vector<8x8xf32>
    %54 = arith.select %8, %52, %53 : vector<8x8xi1>, vector<8x8xf32>
    %cst_27 = arith.constant dense<0xFF800000> : vector<8xf32>
    %55 = vector.multi_reduction <maximumf>, %54, %cst_27 [1] : vector<8x8xf32> to vector<8xf32>
    %56 = vector.shape_cast %55 : vector<8xf32> to vector<8x1xf32>
    %57 = vector.broadcast %56 : vector<8x1xf32> to vector<8x8xf32>
    %58 = arith.subf %54, %57 : vector<8x8xf32>
    %59 = math.exp %58 : vector<8x8xf32>
    %cst_28 = arith.constant dense<0.000000e+00> : vector<8xf32>
    %60 = vector.multi_reduction <add>, %59, %cst_28 [1] : vector<8x8xf32> to vector<8xf32>
    %61 = vector.shape_cast %60 : vector<8xf32> to vector<8x1xf32>
    %62 = tpu.reciprocal %61 {approx = true} : vector<8x1xf32> -> vector<8x1xf32>
    %63 = vector.broadcast %62 : vector<8x1xf32> to vector<8x8xf32>
    %64 = arith.mulf %59, %63 : vector<8x8xf32>
    %65 = arith.truncf %64 : vector<8x8xf32> to vector<8x8xbf16>
    %cst_29 = arith.constant dense<0.000000e+00> : vector<8x8xf32>
    %66 = tpu.matmul %65, %49, %cst_29 {dimension_numbers = #tpu.dot_dimension_numbers<[1], [0], [0], [1], [0, 0, 1, 1], [], []>} : vector<8x8xbf16>, vector<8x8xbf16>, vector<8x8xf32> -> vector<8x8xf32>
    %67 = vector.extract_strided_slice %14 {offsets = [0, 16], sizes = [8, 8], strides = [1, 1]} : vector<8x32xf32> to vector<8x8xf32>
    %68 = arith.truncf %67 : vector<8x8xf32> to vector<8x8xbf16>
    %69 = vector.extract_strided_slice %20 {offsets = [0, 16], sizes = [8, 8], strides = [1, 1]} : vector<8x64xf32> to vector<8x8xf32>
    %70 = arith.truncf %69 : vector<8x8xf32> to vector<8x8xbf16>
    %71 = vector.extract_strided_slice %20 {offsets = [0, 48], sizes = [8, 8], strides = [1, 1]} : vector<8x64xf32> to vector<8x8xf32>
    %72 = arith.truncf %71 : vector<8x8xf32> to vector<8x8xbf16>
    %cst_30 = arith.constant dense<0.000000e+00> : vector<8x8xf32>
    %73 = tpu.matmul %68, %70, %cst_30 {dimension_numbers = #tpu.dot_dimension_numbers<[1], [1], [0], [0], [0, 0, 1, 0], [], []>} : vector<8x8xbf16>, vector<8x8xbf16>, vector<8x8xf32> -> vector<8x8xf32>
    %cst_31 = arith.constant 0.353553385 : f32
    %74 = vector.broadcast %cst_31 : f32 to vector<8x8xf32>
    %75 = arith.mulf %73, %74 : vector<8x8xf32>
    %cst_32 = arith.constant -1.000000e+09 : f32
    %76 = vector.broadcast %cst_32 : f32 to vector<8x8xf32>
    %77 = arith.select %8, %75, %76 : vector<8x8xi1>, vector<8x8xf32>
    %cst_33 = arith.constant dense<0xFF800000> : vector<8xf32>
    %78 = vector.multi_reduction <maximumf>, %77, %cst_33 [1] : vector<8x8xf32> to vector<8xf32>
    %79 = vector.shape_cast %78 : vector<8xf32> to vector<8x1xf32>
    %80 = vector.broadcast %79 : vector<8x1xf32> to vector<8x8xf32>
    %81 = arith.subf %77, %80 : vector<8x8xf32>
    %82 = math.exp %81 : vector<8x8xf32>
    %cst_34 = arith.constant dense<0.000000e+00> : vector<8xf32>
    %83 = vector.multi_reduction <add>, %82, %cst_34 [1] : vector<8x8xf32> to vector<8xf32>
    %84 = vector.shape_cast %83 : vector<8xf32> to vector<8x1xf32>
    %85 = tpu.reciprocal %84 {approx = true} : vector<8x1xf32> -> vector<8x1xf32>
    %86 = vector.broadcast %85 : vector<8x1xf32> to vector<8x8xf32>
    %87 = arith.mulf %82, %86 : vector<8x8xf32>
    %88 = arith.truncf %87 : vector<8x8xf32> to vector<8x8xbf16>
    %cst_35 = arith.constant dense<0.000000e+00> : vector<8x8xf32>
    %89 = tpu.matmul %88, %72, %cst_35 {dimension_numbers = #tpu.dot_dimension_numbers<[1], [0], [0], [1], [0, 0, 1, 1], [], []>} : vector<8x8xbf16>, vector<8x8xbf16>, vector<8x8xf32> -> vector<8x8xf32>
    %90 = vector.extract_strided_slice %14 {offsets = [0, 24], sizes = [8, 8], strides = [1, 1]} : vector<8x32xf32> to vector<8x8xf32>
    %91 = arith.truncf %90 : vector<8x8xf32> to vector<8x8xbf16>
    %92 = vector.extract_strided_slice %20 {offsets = [0, 24], sizes = [8, 8], strides = [1, 1]} : vector<8x64xf32> to vector<8x8xf32>
    %93 = arith.truncf %92 : vector<8x8xf32> to vector<8x8xbf16>
    %94 = vector.extract_strided_slice %20 {offsets = [0, 56], sizes = [8, 8], strides = [1, 1]} : vector<8x64xf32> to vector<8x8xf32>
    %95 = arith.truncf %94 : vector<8x8xf32> to vector<8x8xbf16>
    %cst_36 = arith.constant dense<0.000000e+00> : vector<8x8xf32>
    %96 = tpu.matmul %91, %93, %cst_36 {dimension_numbers = #tpu.dot_dimension_numbers<[1], [1], [0], [0], [0, 0, 1, 0], [], []>} : vector<8x8xbf16>, vector<8x8xbf16>, vector<8x8xf32> -> vector<8x8xf32>
    %cst_37 = arith.constant 0.353553385 : f32
    %97 = vector.broadcast %cst_37 : f32 to vector<8x8xf32>
    %98 = arith.mulf %96, %97 : vector<8x8xf32>
    %cst_38 = arith.constant -1.000000e+09 : f32
    %99 = vector.broadcast %cst_38 : f32 to vector<8x8xf32>
    %100 = arith.select %8, %98, %99 : vector<8x8xi1>, vector<8x8xf32>
    %cst_39 = arith.constant dense<0xFF800000> : vector<8xf32>
    %101 = vector.multi_reduction <maximumf>, %100, %cst_39 [1] : vector<8x8xf32> to vector<8xf32>
    %102 = vector.shape_cast %101 : vector<8xf32> to vector<8x1xf32>
    %103 = vector.broadcast %102 : vector<8x1xf32> to vector<8x8xf32>
    %104 = arith.subf %100, %103 : vector<8x8xf32>
    %105 = math.exp %104 : vector<8x8xf32>
    %cst_40 = arith.constant dense<0.000000e+00> : vector<8xf32>
    %106 = vector.multi_reduction <add>, %105, %cst_40 [1] : vector<8x8xf32> to vector<8xf32>
    %107 = vector.shape_cast %106 : vector<8xf32> to vector<8x1xf32>
    %108 = tpu.reciprocal %107 {approx = true} : vector<8x1xf32> -> vector<8x1xf32>
    %109 = vector.broadcast %108 : vector<8x1xf32> to vector<8x8xf32>
    %110 = arith.mulf %105, %109 : vector<8x8xf32>
    %111 = arith.truncf %110 : vector<8x8xf32> to vector<8x8xbf16>
    %cst_41 = arith.constant dense<0.000000e+00> : vector<8x8xf32>
    %112 = tpu.matmul %111, %95, %cst_41 {dimension_numbers = #tpu.dot_dimension_numbers<[1], [0], [0], [1], [0, 0, 1, 1], [], []>} : vector<8x8xbf16>, vector<8x8xbf16>, vector<8x8xf32> -> vector<8x8xf32>
    %113 = tpu.concatenate %43, %66, %89, %112 in 1 : vector<8x8xf32>, vector<8x8xf32>, vector<8x8xf32>, vector<8x8xf32> -> vector<8x32xf32>
    %114 = arith.truncf %113 : vector<8x32xf32> to vector<8x32xbf16>
    %c0_42 = arith.constant 0 : index
    %c0_43 = arith.constant 0 : index
    %115 = vector.load %arg8[%c0_42, %c0_43] : memref<32x32xbf16, #tpu.memory_space<vmem>>, vector<32x32xbf16>
    %cst_44 = arith.constant dense<0.000000e+00> : vector<8x32xf32>
    %116 = tpu.matmul %114, %115, %cst_44 {dimension_numbers = #tpu.dot_dimension_numbers<[1], [0], [0], [1], [0, 0, 1, 1], [], []>} : vector<8x32xbf16>, vector<32x32xbf16>, vector<8x32xf32> -> vector<8x32xf32>
    %c0_45 = arith.constant 0 : index
    %c0_46 = arith.constant 0 : index
    %117 = vector.load %arg9[%c0_45, %c0_46] : memref<1x32xf32, #tpu.memory_space<vmem>>, vector<1x32xf32>
    %118 = vector.broadcast %117 : vector<1x32xf32> to vector<8x32xf32>
    %119 = arith.addf %116, %118 : vector<8x32xf32>
    %120 = arith.addf %119, %1 : vector<8x32xf32>
    %cst_47 = arith.constant dense<0.000000e+00> : vector<8xf32>
    %121 = vector.multi_reduction <add>, %120, %cst_47 [1] : vector<8x32xf32> to vector<8xf32>
    %122 = vector.shape_cast %121 : vector<8xf32> to vector<8x1xf32>
    %cst_48 = arith.constant 3.200000e+01 : f32
    %123 = vector.broadcast %cst_48 : f32 to vector<8x1xf32>
    %124 = arith.divf %122, %123 : vector<8x1xf32>
    %125 = vector.broadcast %124 : vector<8x1xf32> to vector<8x32xf32>
    %126 = arith.subf %120, %125 : vector<8x32xf32>
    %127 = arith.mulf %126, %126 : vector<8x32xf32>
    %cst_49 = arith.constant dense<0.000000e+00> : vector<8xf32>
    %128 = vector.multi_reduction <add>, %127, %cst_49 [1] : vector<8x32xf32> to vector<8xf32>
    %129 = vector.shape_cast %128 : vector<8xf32> to vector<8x1xf32>
    %cst_50 = arith.constant 3.200000e+01 : f32
    %130 = vector.broadcast %cst_50 : f32 to vector<8x1xf32>
    %131 = arith.divf %129, %130 : vector<8x1xf32>
    %132 = vector.broadcast %124 : vector<8x1xf32> to vector<8x32xf32>
    %133 = arith.subf %120, %132 : vector<8x32xf32>
    %cst_51 = arith.constant 9.99999996E-13 : f32
    %134 = vector.broadcast %cst_51 : f32 to vector<8x1xf32>
    %135 = arith.addf %131, %134 : vector<8x1xf32>
    %136 = math.rsqrt %135 : vector<8x1xf32>
    %137 = vector.broadcast %136 : vector<8x1xf32> to vector<8x32xf32>
    %138 = arith.mulf %133, %137 : vector<8x32xf32>
    %c0_52 = arith.constant 0 : index
    %c0_53 = arith.constant 0 : index
    %139 = vector.load %arg10[%c0_52, %c0_53] : memref<1x32xf32, #tpu.memory_space<vmem>>, vector<1x32xf32>
    %140 = vector.broadcast %139 : vector<1x32xf32> to vector<8x32xf32>
    %141 = arith.mulf %138, %140 : vector<8x32xf32>
    %c0_54 = arith.constant 0 : index
    %c0_55 = arith.constant 0 : index
    %142 = vector.load %arg11[%c0_54, %c0_55] : memref<1x32xf32, #tpu.memory_space<vmem>>, vector<1x32xf32>
    %143 = vector.broadcast %142 : vector<1x32xf32> to vector<8x32xf32>
    %144 = arith.addf %141, %143 : vector<8x32xf32>
    %c0_56 = arith.constant 0 : index
    %c0_57 = arith.constant 0 : index
    %c0_58 = arith.constant 0 : index
    %145 = vector.load %arg12[%c0_56, %c0_57, %c0_58] : memref<1x8x32xf32, #tpu.memory_space<vmem>>, vector<1x8x32xf32>
    %146 = vector.shape_cast %145 : vector<1x8x32xf32> to vector<8x32xf32>
    %147 = vector.shape_cast %144 : vector<8x32xf32> to vector<1x8x32xf32>
    tpu.vector_store %arg12[%c0_56, %c0_57, %c0_58], %147 {strides = array<i32>} : memref<1x8x32xf32, #tpu.memory_space<vmem>>, vector<1x8x32xf32>,
    return
  }
  func.func @transform_0(%arg0: i32) -> (i32, i32, i32) {
    %c0_i32 = arith.constant 0 : i32
    %c0_i32_0 = arith.constant 0 : i32
    %c0_i32_1 = arith.constant 0 : i32
    return %arg0, %c0_i32, %c0_i32_0 : i32, i32, i32
  }
  func.func @transform_1(%arg0: i32) -> (i32, i32, i32) {
    %c0_i32 = arith.constant 0 : i32
    %c0_i32_0 = arith.constant 0 : i32
    %c0_i32_1 = arith.constant 0 : i32
    return %arg0, %c0_i32, %c0_i32_0 : i32, i32, i32
  }
  func.func @transform_2(%arg0: i32) -> (i32, i32, i32) {
    %c0_i32 = arith.constant 0 : i32
    %c0_i32_0 = arith.constant 0 : i32
    %c0_i32_1 = arith.constant 0 : i32
    return %arg0, %c0_i32, %c0_i32_0 : i32, i32, i32
  }
  func.func @transform_3(%arg0: i32) -> (i32, i32) {
    %c0_i32 = arith.constant 0 : i32
    %c0_i32_0 = arith.constant 0 : i32
    %c0_i32_1 = arith.constant 0 : i32
    return %c0_i32, %c0_i32_0 : i32, i32
  }
  func.func @transform_4(%arg0: i32) -> (i32, i32) {
    %c0_i32 = arith.constant 0 : i32
    %c0_i32_0 = arith.constant 0 : i32
    %c0_i32_1 = arith.constant 0 : i32
    return %c0_i32, %c0_i32_0 : i32, i32
  }
  func.func @transform_5(%arg0: i32) -> (i32, i32) {
    %c0_i32 = arith.constant 0 : i32
    %c0_i32_0 = arith.constant 0 : i32
    %c0_i32_1 = arith.constant 0 : i32
    return %c0_i32, %c0_i32_0 : i32, i32
  }
  func.func @transform_6(%arg0: i32) -> (i32, i32) {
    %c0_i32 = arith.constant 0 : i32
    %c0_i32_0 = arith.constant 0 : i32
    %c0_i32_1 = arith.constant 0 : i32
    return %c0_i32, %c0_i32_0 : i32, i32
  }
  func.func @transform_7(%arg0: i32) -> (i32, i32) {
    %c0_i32 = arith.constant 0 : i32
    %c0_i32_0 = arith.constant 0 : i32
    %c0_i32_1 = arith.constant 0 : i32
    return %c0_i32, %c0_i32_0 : i32, i32
  }
  func.func @transform_8(%arg0: i32) -> (i32, i32) {
    %c0_i32 = arith.constant 0 : i32
    %c0_i32_0 = arith.constant 0 : i32
    %c0_i32_1 = arith.constant 0 : i32
    return %c0_i32, %c0_i32_0 : i32, i32
  }
  func.func @transform_9(%arg0: i32) -> (i32, i32) {
    %c0_i32 = arith.constant 0 : i32
    %c0_i32_0 = arith.constant 0 : i32
    %c0_i32_1 = arith.constant 0 : i32
    return %c0_i32, %c0_i32_0 : i32, i32
  }
  func.func @transform_10(%arg0: i32) -> (i32, i32) {
    %c0_i32 = arith.constant 0 : i32
    %c0_i32_0 = arith.constant 0 : i32
    %c0_i32_1 = arith.constant 0 : i32
    return %c0_i32, %c0_i32_0 : i32, i32
  }
  func.func @transform_11(%arg0: i32) -> (i32, i32, i32) {
    %c0_i32 = arith.constant 0 : i32
    %c0_i32_0 = arith.constant 0 : i32
    %c0_i32_1 = arith.constant 0 : i32
    return %arg0, %c0_i32, %c0_i32_0 : i32, i32, i32
  }
}

</mosaic_0001>

<bundles_post_ra>
// kernel: decoder_layer_forward.5
= control target key start
LH: loop header
LB: loop body
LE: loop exit
PB: predicated region body
PF: predicated region fallthrough
CT: control target
= control target key end

     0   :  { %12 = vsyncpa [#allocation3], 0  ;;  %s755_s0 = inlined_call_operand.hbm [shape: f32[16,32], index: 0, kind: input, shape index: {}]   ;;  %s756_s1 = inlined_call_operand.hbm [shape: bf16[32,64], index: 1, kind: input, shape index: {}]   ;;  %s757_s2 = inlined_call_operand.hbm [shape: f32[1,64], index: 2, kind: input, shape index: {}]   ;;  %s758_s3 = inlined_call_operand.hbm [shape: bf16[64,32], index: 3, kind: input, shape index: {}]   ;;  %s759_s4 = inlined_call_operand.hbm [shape: f32[1,32], index: 4, kind: input, shape index: {}]   ;;  %s760_s5 = inlined_call_operand.hbm [shape: f32[1,32], index: 5, kind: input, shape index: {}]   ;;  %s761_s6 = inlined_call_operand.hbm [shape: f32[1,32], index: 6, kind: input, shape index: {}]   ;;  %s762_s7 = inlined_call_operand.hbm [shape: f32[16,32], index: 7, kind: output, shape index: {}]  }
   0x1   :  { %13 = vsyncpa [#allocation6], 0 }
   0x2   :  { %14 = vsyncpa [#allocation9], 0 }
   0x3   :  { %15 = vsyncpa [#allocation12], 0 }
   0x4   :  { %16 = vsyncpa [#allocation4], 0  ;;  %s592_s24 = smov [#allocation5]   ;;  %s406_s28 = scalar_lea.hbm %s756_s1, 256 }
   0x5   :  { %s34_s25 = sshll.u32 %s592_s24, 4  ;;  %p407_p0 = scmp.ne.s32.totalorder %s756_s1, %s406_s28  ;;  %s35_s25 = int_to_ptr.vmem [resolvable:$true] %s34_s25 }
   0x6   :  { %p410_p1 = scmp.lt.u32.totalorder %s406_s28, %s756_s1 }
   0x8   :  { %p412_p2 = pnand %p410_p1, %p407_p0 }
   0xa   :  { %415 = shalt.err (!%p412_p2)
}
   0xb   :  { %s416_s10 = scalar_lea.vmem %s35_s25, 256  ;;  %p421_p4 = scmp.lt.s32.totalorder %s35_s25, %s35_s25 }
   0xc   :  { %p417_p3 = scmp.ne.s32.totalorder %s35_s25, %s416_s10  ;;  %p422_p5 = scmp.lt.s32.totalorder %s416_s10, %s416_s10 }
   0xe   :  { %p423_p6 = por %p422_p5, %p421_p4 }
  0x10   :  { %p424_p7 = pnand %p423_p6, %p417_p3 }
  0x12   :  { %427 = shalt.err (!%p424_p7)
}
  0x13   :  { %s593_s11 = smov 64   ;;  %s594_s12 = smov 4  }
  0x14   :  { %40 = dma.hbm_to_vmem [thread:$0]  %s756_s1, 256, %s35_s25, [#allocation6], %s593_s11, %s593_s11, %s594_s12  }
  0x15   :  { %s595_s15 = smov [#allocation8]   ;;  %s596_s17 = smov [#allocation11]  }
  0x16   :  { %s56_s16 = sshll.u32 %s595_s15, 4  ;;  %s79_s18 = sshll.u32 %s596_s17, 4  ;;  %s57_s16 = int_to_ptr.vmem [resolvable:$true] %s56_s16  ;;  %s80_s18 = int_to_ptr.vmem [resolvable:$true] %s79_s18 }
  0x17   :  { %s428_s21 = scalar_lea.hbm %s758_s3, 512 }
  0x18   :  { %p429_p8 = scmp.ne.s32.totalorder %s758_s3, %s428_s21  ;;  %p432_p9 = scmp.lt.u32.totalorder %s428_s21, %s758_s3 }
  0x1a   :  { %p434_p10 = pnand %p432_p9, %p429_p8 }
  0x1c   :  { %437 = shalt.err (!%p434_p10)
}
  0x1d   :  { %s438_s1 = scalar_lea.vmem %s57_s16, 512  ;;  %p443_p12 = scmp.lt.s32.totalorder %s57_s16, %s57_s16 }
  0x1e   :  { %p439_p11 = scmp.ne.s32.totalorder %s57_s16, %s438_s1  ;;  %p444_p13 = scmp.lt.s32.totalorder %s438_s1, %s438_s1 }
  0x20   :  { %p445_p0 = por %p444_p13, %p443_p12 }
  0x22   :  { %p446_p1 = pnand %p445_p0, %p439_p11 }
  0x24   :  { %449 = shalt.err (!%p446_p1)
}
  0x25   :  { %62 = dma.hbm_to_vmem [thread:$0]  %s758_s3, 512, %s57_s16, [#allocation9], %s593_s11, %s593_s11, %s594_s12  }
  0x26   :  { %s450_s30 = scalar_lea.hbm %s760_s5, 16 }
  0x27   :  { %p451_p2 = scmp.ne.s32.totalorder %s760_s5, %s450_s30  ;;  %p454_p3 = scmp.lt.u32.totalorder %s450_s30, %s760_s5 }
  0x29   :  { %p456_p4 = pnand %p454_p3, %p451_p2 }
  0x2b   :  { %459 = shalt.err (!%p456_p4)
}
  0x2c   :  { %s460_s14 = scalar_lea.vmem %s80_s18, 16  ;;  %s464_s15 = scalar_lea.vmem %s80_s18, 32 }
  0x2d   :  { %p461_p5 = scmp.ne.s32.totalorder %s80_s18, %s460_s14  ;;  %p465_p6 = scmp.lt.s32.totalorder %s80_s18, %s80_s18 }
  0x2e   :  { %p466_p7 = scmp.lt.s32.totalorder %s464_s15, %s460_s14 }
  0x30   :  { %p467_p8 = por %p466_p7, %p465_p6 }
  0x32   :  { %p468_p9 = pnand %p467_p8, %p461_p5 }
  0x34   :  { %471 = shalt.err (!%p468_p9)
}
  0x35   :  { %82 = dma.hbm_to_vmem [thread:$0]  %s760_s5, 16, %s80_s18, [#allocation12]  }
  0x36   :  { %s597_s12 = smov [#allocation2]   ;;  %s472_s20 = scalar_lea.hbm %s755_s0, 256 }
  0x37   :  { %s22_s16 = sshll.u32 %s597_s12, 4  ;;  %p473_p10 = scmp.ne.s32.totalorder %s755_s0, %s472_s20  ;;  %s23_s16 = int_to_ptr.vmem [resolvable:$true] %s22_s16 }
  0x38   :  { %p476_p11 = scmp.lt.u32.totalorder %s472_s20, %s755_s0 }
  0x3a   :  { %p478_p12 = pnand %p476_p11, %p473_p10 }
  0x3c   :  { %481 = shalt.err (!%p478_p12)
}
  0x3d   :  { %s482_s26 = scalar_lea.vmem %s23_s16, 256  ;;  %p487_p0 = scmp.lt.s32.totalorder %s23_s16, %s23_s16 }
  0x3e   :  { %p483_p13 = scmp.ne.s32.totalorder %s23_s16, %s482_s26  ;;  %p488_p1 = scmp.lt.s32.totalorder %s482_s26, %s482_s26 }
  0x40   :  { %p489_p2 = por %p488_p1, %p487_p0 }
  0x42   :  { %p490_p3 = pnand %p489_p2, %p483_p13 }
  0x44   :  { %493 = shalt.err (!%p490_p3)
}
  0x45   :  { %s598_s5 = smov 128   ;;  %s599_s18 = smov 8  }
  0x46   :  { %28 = dma.hbm_to_vmem [thread:$0]  %s755_s0, 256, %s23_s16, [#allocation3], %s598_s5, %s598_s5, %s599_s18  }
  0x47   :  { %s600_s27 = smov [#allocation7]   ;;  %s601_s29 = smov [#allocation10]  }
  0x48   :  { %s47_s28 = sshll.u32 %s600_s27, 4  ;;  %s69_s30 = sshll.u32 %s601_s29, 4  ;;  %s48_s28 = int_to_ptr.vmem [resolvable:$true] %s47_s28  ;;  %s70_s30 = int_to_ptr.vmem [resolvable:$true] %s69_s30 }
  0x49   :  { %s494_s10 = scalar_lea.hbm %s757_s2, 16 }
  0x4a   :  { %p495_p4 = scmp.ne.s32.totalorder %s757_s2, %s494_s10  ;;  %p498_p5 = scmp.lt.u32.totalorder %s494_s10, %s757_s2 }
  0x4c   :  { %p500_p6 = pnand %p498_p5, %p495_p4 }
  0x4e   :  { %503 = shalt.err (!%p500_p6)
}
  0x4f   :  { %s504_s0 = scalar_lea.vmem %s48_s28, 16  ;;  %s508_s11 = scalar_lea.vmem %s48_s28, 32 }
  0x50   :  { %p505_p7 = scmp.ne.s32.totalorder %s48_s28, %s504_s0  ;;  %p509_p8 = scmp.lt.s32.totalorder %s48_s28, %s48_s28 }
  0x51   :  { %p510_p9 = scmp.lt.s32.totalorder %s508_s11, %s504_s0 }
  0x53   :  { %p511_p10 = por %p510_p9, %p509_p8 }
  0x55   :  { %p512_p11 = pnand %p511_p10, %p505_p7 }
  0x57   :  { %515 = shalt.err (!%p512_p11)
}
  0x58   :  { %50 = dma.hbm_to_vmem [thread:$0]  %s757_s2, 16, %s48_s28, [#allocation6]  }
  0x59   :  { %s516_s20 = scalar_lea.hbm %s759_s4, 16 }
  0x5a   :  { %p517_p12 = scmp.ne.s32.totalorder %s759_s4, %s516_s20  ;;  %p520_p13 = scmp.lt.u32.totalorder %s516_s20, %s759_s4 }
  0x5c   :  { %p522_p0 = pnand %p520_p13, %p517_p12 }
  0x5e   :  { %525 = shalt.err (!%p522_p0)
}
  0x5f   :  { %s526_s26 = scalar_lea.vmem %s70_s30, 16  ;;  %s530_s1 = scalar_lea.vmem %s70_s30, 32 }
  0x60   :  { %p527_p1 = scmp.ne.s32.totalorder %s70_s30, %s526_s26  ;;  %p531_p2 = scmp.lt.s32.totalorder %s70_s30, %s70_s30 }
  0x61   :  { %p532_p3 = scmp.lt.s32.totalorder %s530_s1, %s526_s26 }
  0x63   :  { %p533_p4 = por %p532_p3, %p531_p2 }
  0x65   :  { %p534_p5 = pnand %p533_p4, %p527_p1 }
  0x67   :  { %537 = shalt.err (!%p534_p5)
}
  0x68   :  { %72 = dma.hbm_to_vmem [thread:$0]  %s759_s4, 16, %s70_s30, [#allocation9]  }
  0x69   :  { %s602_s27 = smov [#allocation13]   ;;  %s538_s9 = scalar_lea.hbm %s761_s6, 16 }
  0x6a   :  { %s89_s28 = sshll.u32 %s602_s27, 4  ;;  %p539_p6 = scmp.ne.s32.totalorder %s761_s6, %s538_s9  ;;  %s90_s28 = int_to_ptr.vmem [resolvable:$true] %s89_s28 }
  0x6b   :  { %p542_p7 = scmp.lt.u32.totalorder %s538_s9, %s761_s6 }
  0x6d   :  { %p544_p8 = pnand %p542_p7, %p539_p6 }
  0x6f   :  { %547 = shalt.err (!%p544_p8)
}
  0x70   :  { %s548_s3 = scalar_lea.vmem %s90_s28, 16  ;;  %s552_s4 = scalar_lea.vmem %s90_s28, 32 }
  0x71   :  { %p549_p9 = scmp.ne.s32.totalorder %s90_s28, %s548_s3  ;;  %p553_p10 = scmp.lt.s32.totalorder %s90_s28, %s90_s28 }
  0x72   :  { %p554_p11 = scmp.lt.s32.totalorder %s552_s4, %s548_s3 }
  0x74   :  { %p555_p12 = por %p554_p11, %p553_p10 }
  0x76   :  { %p556_p13 = pnand %p555_p12, %p549_p9 }
  0x78   :  { %559 = shalt.err (!%p556_p13)
}
  0x79   :  { %92 = dma.hbm_to_vmem [thread:$0]  %s761_s6, 16, %s90_s28, [#allocation12]  }
  0x7a   :  { %582 = dma.done.wait [#allocation3], 256  }
  0x7b   :  { %583 = vsyncadd [#allocation3], 4294967040 }
  0x7c   :  { %584 = dma.done.wait [#allocation6], 272  }
  0x7d   :  { %585 = vsyncadd [#allocation6], 4294967024 }
  0x7e   :  { %586 = dma.done.wait [#allocation9], 528  }
  0x7f   :  { %587 = vsyncadd [#allocation9], 4294966768 }
  0x80   :  { %588 = dma.done.wait [#allocation12], 32  }
  0x81   :  { %589 = vsyncadd [#allocation12], 4294967264  ;;  %v603_v0 = vmov 0.0   ;;  %vm604_vm0 = vmmov 0   ;;  %v396_v1 = vld [vmem:[#allocation5] sm:$0xff]   ;;  %v397_v2 = vld [vmem:[#allocation5 + $0x8] sm:$0xff]  }
  0x82   :  { %362 = vmatprep.subr.bf16.mxu0 %v603_v0  ;;  %366 = vmatprep.mubr.msk.bf16.mxu0 %vm604_vm0, %v603_v0  ;;  %v115_v3 = vld [vmem:[#allocation2] sm:$0xff]  ;;  %v116_v4 = vld [vmem:[#allocation2 + $0x8] sm:$0xff]  ;;  %vm141_vm1 = vcmask 261120   ;;  %v400_v8 = vld [vmem:[#allocation8 + $0x10] sm:$0xff]   ;;  %vm228_vm2 = vcmask 523264   ;;  %s605_s6 = smov [#allocation14]  }
  0x83   :  { %370 = vmatprep.subr.bf16.mxu1 %v603_v0  ;;  %378 = vmatprep.mubr.msk.bf16.mxu1 %vm604_vm0, %v603_v0  ;;  %v398_v5 = vld [vmem:[#allocation8] sm:$0xff]   ;;  %v399_v6 = vld [vmem:[#allocation8 + $0x8] sm:$0xff]   ;;  %v117_v7 = vpack.c.bf16 %v116_v4, %v115_v3  ;;  %v401_v9 = vld [vmem:[#allocation8 + $0x18] sm:$0xff]   ;;  %s327_s11 = sshll.u32 %s605_s6, 4  ;;  %s328_s11 = int_to_ptr.vmem [resolvable:$true] %s327_s11 }
  0x84   :  { %363 = vmatpush3.bf16.msra.mxu0 %v396_v1  ;;  %371 = vmatpush3.bf16.msra.mxu1 %v398_v5  ;;  %v342_v10 = vld [vmem:[#allocation7] ss:$0 sm:$0xff]  ;;  %v346_v20 = vld [vmem:[#allocation10] ss:$0 sm:$0xff]  ;;  %v352_v48 = vld [vmem:[#allocation11] ss:$0 sm:$0xff]  ;;  %p565_p1 = scmp.lt.s32.totalorder %s328_s11, %s328_s11 }
  0x85   :  { %364 = vmatprep.subr.bf16.mxu0 %v603_v0  ;;  %372 = vmatprep.subr.bf16.mxu1 %v603_v0  ;;  %v353_v50 = vld [vmem:[#allocation13] ss:$0 sm:$0xff]  ;;  %s560_s12 = scalar_lea.vmem %s328_s11, 256 }
  0x86   :  { %p561_p0 = scmp.ne.s32.totalorder %s328_s11, %s560_s12  ;;  %p566_p2 = scmp.lt.s32.totalorder %s560_s12, %s560_s12 }
  0x88   :  { %365 = vmatpush3.bf16.msra.mxu0 %v397_v2  ;;  %373 = vmatpush3.bf16.msra.mxu1 %v399_v6  ;;  %p567_p3 = por %p566_p2, %p565_p1 }
  0x89   :  { %374 = vmatprep.subr.bf16.mxu1 %v603_v0 }
  0x8a   :  { %p568_p4 = pnand %p567_p3, %p561_p0 }
  0x8b   :  { %367 = vmatmul.mubr.msk.bf16.vlgmr.msra.gmra.mrb[0].mxu0 %vm141_vm1, %v117_v7 }
  0x8c   :  { %375 = vmatpush3.bf16.msra.mxu1 %v400_v8 }
  0x8d   :  { %376 = vmatprep.subr.bf16.mxu1 %v603_v0 }
  0x90   :  { %377 = vmatpush3.bf16.msra.mxu1 %v401_v9 }
 0x15e   :  { %v179_v11 = vpop.f32.mrb[0].mxu0 }
 0x15f   :  { %v180_v12 = vadd.f32 %v342_v10, %v179_v11  ;;  %v368_v13 = vpop.f32.mrb[1].mxu0 }
 0x160   :  { %v182_v14 = vpop.f32.mrb[2].mxu0 }
 0x161   :  { %v183_v15 = vadd.f32 %v342_v10, %v182_v14  ;;  %v369_v16 = vpop.f32.mrb[3].mxu0  ;;  %v186_v17 = vmax.f32 %v180_v12, 0.0 }
 0x163   :  { %v187_v18 = vmax.f32 %v183_v15, 0.0 }
 0x165   :  { %v188_v19 = vpack.c.bf16 %v187_v18, %v186_v17 }
 0x167   :  { %379 = vmatmul.mubr.msk.bf16.vlgmr.msra.gmra.mrb[0].mxu1 %vm228_vm2, %v188_v19 }
 0x23a   :  { %v266_v21 = vpop.f32.mrb[0].mxu1 }
 0x23b   :  { %v267_v22 = vadd.f32 %v346_v20, %v266_v21  ;;  %v380_v23 = vpop.f32.mrb[1].mxu1 }
 0x23c   :  { %v269_v24 = vpop.f32.mrb[2].mxu1 }
 0x23d   :  { %v270_v25 = vadd.f32 %v346_v20, %v269_v24  ;;  %v381_v26 = vpop.f32.mrb[3].mxu1  ;;  %v273_v27 = vadd.f32 %v267_v22, %v115_v3 }
 0x23f   :  { %v275_v28 = vsel %vm141_vm1, %v273_v27, 0.0  ;;  %v274_v29 = vadd.f32 %v270_v25, %v116_v4 }
 0x240   :  { %276 = vadd.xlane.f32.xlu0 %v275_v28 }
 0x241   :  { %v278_v30 = vsel %vm141_vm1, %v274_v29, 0.0 }
 0x244   :  { %279 = vadd.xlane.f32.xlu0 %v278_v30 }
 0x2cd   :  { %v277_v31 = vpop.xlane.xlu0 %276 }
 0x2ce   :  { %v282_v32 = vmul.f32 0.03125, %v277_v31 }
 0x2d0   :  { %v284_v33 = vsub.f32 %v273_v27, %v282_v32 }
 0x2d1   :  { %v280_v34 = vpop.xlane.xlu0 %279 }
 0x2d2   :  { %v283_v35 = vmul.f32 0.03125, %v280_v34  ;;  %v286_v36 = vmul.f32 %v284_v33, %v284_v33 }
 0x2d4   :  { %v285_v37 = vsub.f32 %v274_v29, %v283_v35  ;;  %v288_v38 = vsel %vm141_vm1, %v286_v36, 0.0 }
 0x2d5   :  { %289 = vadd.xlane.f32.xlu1 %v288_v38 }
 0x2d6   :  { %v287_v39 = vmul.f32 %v285_v37, %v285_v37 }
 0x2d8   :  { %v291_v40 = vsel %vm141_vm1, %v287_v39, 0.0 }
 0x2d9   :  { %292 = vadd.xlane.f32.xlu1 %v291_v40 }
 0x362   :  { %v290_v41 = vpop.xlane.xlu1 %289 }
 0x363   :  { %v294_v42 = vmul.f32 0.03125, %v290_v41 }
 0x365   :  { %v296_v43 = vadd.f32 1e-12, %v294_v42 }
 0x366   :  { %v293_v44 = vpop.xlane.xlu1 %292 }
 0x367   :  { %402 = vrsqrt.f32 %v296_v43  ;;  %v295_v45 = vmul.f32 0.03125, %v293_v44 }
 0x369   :  { %v297_v46 = vadd.f32 1e-12, %v295_v45 }
 0x36b   :  { %404 = vrsqrt.f32 %v297_v46 }
 0x371   :  { %v403_v47 = vpop.eup %402 }
 0x372   :  { %v300_v49 = vmul.f32 %v403_v47, %v284_v33 }
 0x374   :  { %v309_v51 = vmul.f32 %v352_v48, %v300_v49 }
 0x375   :  { %v405_v52 = vpop.eup %404 }
 0x376   :  { %v301_v53 = vmul.f32 %v405_v52, %v285_v37  ;;  %v318_v54 = vadd.f32 %v353_v50, %v309_v51 }
 0x378   :  { %v310_v55 = vmul.f32 %v352_v48, %v301_v53  ;;  %320 = vst.msk [vmem:[#allocation14] sm:$0xff] %vm141_vm1, %v318_v54 }
 0x37a   :  { %v319_v56 = vadd.f32 %v353_v50, %v310_v55 }
 0x37c   :  { %321 = vst.msk [vmem:[#allocation14 + $0x8] sm:$0xff] %vm141_vm1, %v319_v56 }
 0x37d   :  { %571 = shalt.err (!%p568_p4)
}
 0x37e   :  { %s572_s19 = scalar_lea.hbm %s762_s7, 256 }
 0x37f   :  { %p573_p5 = scmp.ne.s32.totalorder %s762_s7, %s572_s19  ;;  %p576_p6 = scmp.lt.u32.totalorder %s572_s19, %s762_s7 }
 0x381   :  { %p578_p7 = pnand %p576_p6, %p573_p5 }
 0x383   :  { %581 = shalt.err (!%p578_p7)
}
 0x384   :  { %333 = dma.vmem_to_hbm [thread:$0]  %s328_s11, 256, %s762_s7, [#allocation4], %s598_s5, %s598_s5, %s599_s18  }
 0x385   :  { %590 = dma.done.wait [#allocation4], 256  }
 0x386   :  { %591 = vsyncadd [#allocation4], 4294967040 }
 0x387   :  { %337 = vsyncpa [#allocation3], 1 }
 0x388   :  { %338 = vsyncpa [#allocation6], 1 }
 0x389   :  { %339 = vsyncpa [#allocation9], 1 }
 0x38a   :  { %340 = vsyncpa [#allocation12], 1 }
 0x38b   :  { %341 = vsyncpa [#allocation4], 1 }

// kernel: decoder_layer_forward.3
= control target key start
LH: loop header
LB: loop body
LE: loop exit
PB: predicated region body
PF: predicated region fallthrough
CT: control target
= control target key end

     0   :  { %s2847_s0 = inlined_call_operand.hbm [shape: f32[2,8,32], index: 0, kind: input, shape index: {}, may-alias: {0,1}]   ;;  %s2848_s1 = inlined_call_operand.hbm [shape: f32[2,8,32], index: 1, kind: input, shape index: {}, may-alias: {0,1}]   ;;  %s2849_s2 = inlined_call_operand.hbm [shape: s8[2,8,8], index: 2, kind: input, shape index: {}]   ;;  %s2850_s3 = inlined_call_operand.hbm [shape: bf16[32,32], index: 3, kind: input, shape index: {}]   ;;  %s2851_s4 = inlined_call_operand.hbm [shape: f32[1,32], index: 4, kind: input, shape index: {}]   ;;  %s2852_s5 = inlined_call_operand.hbm [shape: bf16[32,64], index: 5, kind: input, shape index: {}]   ;;  %s2853_s6 = inlined_call_operand.hbm [shape: f32[1,64], index: 6, kind: input, shape index: {}]   ;;  %s2854_s7 = inlined_call_operand.hbm [shape: bf16[32,32], index: 7, kind: input, shape index: {}]   ;;  %s2855_s8 = inlined_call_operand.hbm [shape: f32[1,32], index: 8, kind: input, shape index: {}]   ;;  %s2856_s9 = inlined_call_operand.hbm [shape: f32[1,32], index: 9, kind: input, shape index: {}]   ;;  %s2857_s10 = inlined_call_operand.hbm [shape: f32[1,32], index: 10, kind: input, shape index: {}]   ;;  %s2858_s11 = inlined_call_operand.hbm [shape: f32[2,8,32], index: 11, kind: output, shape index: {}]  }
   0x1   :  { %2879 = sst [smem:[#allocation32_spill]] %s2848_s1 }
   0x2   :  { %2880 = sst [smem:[#allocation33_spill]] %s2849_s2 }
   0x3   :  { %2881 = sst [smem:[#allocation34_spill]] %s2850_s3 }
   0x4   :  { %2882 = sst [smem:[#allocation35_spill]] %s2852_s5 }
   0x5   :  { %2883 = sst [smem:[#allocation36_spill]] %s2854_s7 }
   0x6   :  { %2884 = sst [smem:[#allocation37_spill]] %s2856_s9 }
   0x7   :  { %2885 = sst [smem:[#allocation38_spill]] %s2858_s11 }
   0x8   :  { %16 = vsyncpa [#allocation3], 0 }
   0x9   :  { %18 = vsyncpa [#allocation3 + $0x1], 0 }
   0xa   :  { %19 = vsyncpa [#allocation6], 0 }
   0xb   :  { %21 = vsyncpa [#allocation6 + $0x1], 0 }
   0xc   :  { %22 = vsyncpa [#allocation9], 0 }
   0xd   :  { %23 = vsyncpa [#allocation12], 0 }
   0xe   :  { %24 = vsyncpa [#allocation15], 0 }
   0xf   :  { %25 = vsyncpa [#allocation18], 0 }
  0x10   :  { %26 = vsyncpa [#allocation4], 0 }
  0x11   :  { %28 = vsyncpa [#allocation4 + $0x1], 0  ;;  %s2306_s17 = smov 0   ;;  %s2308_s18 = smov 0  }
  0x12   :  { %s2310_s19 = smov 0   ;;  %s2312_s20 = smov 0  }
  0x13 LB: > { %2886 = sst [smem:[#allocation28_spill]] %s2214_s19  ;;  %s2220_s21 = smov [#allocation8]   ;;  %s2218_s20 = sphi %s2312_s20, %s2927_s20   ;;  %s2214_s19 = sphi %s2310_s19, %s2929_s19   ;;  %s2210_s18 = sphi %s2308_s18, %s2931_s18   ;;  %s2206_s17 = sphi %s2306_s17, %s2930_s17  }
  0x14   : > { %s323_s22 = sshll.u32 %s2220_s21, 4  ;;  %s2327_s23 = sadd.s32 4294967295, %s2218_s20   ;;  %s2332_s22 = int_to_ptr.vmem [resolvable:$true] %s323_s22 }
  0x15   : > { %p1491_p0 = scmp.ge.s32.totalorder %s2218_s20, 1  ;;  %p2862_p1 = scmp.eq.s32.totalorder %s2327_s23, 0 }
  0x16   : > { %p311_p2 = scmp.lt.s32.totalorder %s2218_s20, 3  ;;  %s2221_s25 = smov [#allocation11]  }
  0x17   : > { %s347_s26 = sshll.u32 %s2221_s25, 4  ;;  %s2222_s28 = smov [#allocation14]   ;;  %s2347_s26 = int_to_ptr.vmem [resolvable:$true] %s347_s26 }
  0x18   : > { %p2334_p3 = pnand %p1491_p0, %p311_p2  ;;  %s371_s29 = sshll.u32 %s2222_s28, 4  ;;  %s2349_s29 = int_to_ptr.vmem [resolvable:$true] %s371_s29 }
  0x19   : > { %s2890_s3 = sld [smem:[#allocation34_spill]] }
  0x1a   : > { %s2887_s24 = scalar_select %p2334_p3, 1, 0 }
  0x1b   : > { %p1683_p5 = pneg %p2334_p3 }
  0x1c   : > { %2888 = sst [smem:[#allocation29_spill]] %s2887_s24 }
  0x1d   : > { %p2343_p6 = pnand %p1683_p5, %p2862_p1 }
  0x1f   : > { %s2889_s27 = scalar_select %p2343_p6, 1, 0 }
  0x20   : > { %s1818_s13 = scalar_lea.hbm %s2890_s3, 256  ;;  %p2359_p8 = pneg %p2343_p6 }
  0x21   : > { %p1819_p7 = scmp.ne.s32.totalorder %s2890_s3, %s1818_s13  ;;  %p1825_p11 = scmp.lt.u32.totalorder %s1818_s13, %s2890_s3 }
  0x22   : > { %s2891_s16 = scalar_select %p2359_p8, 1, 0 }
  0x23   : > { %p1821_p9 = pnand %p2359_p8, %p1819_p7 }
  0x25   : > { %p1822_p10 = pneg %p1821_p9 }
  0x27   : > { %p1827_p12 = pnand %p1825_p11, %p1822_p10 }
  0x29   : > { %1830 = shalt.err (!%p1827_p12)
}
  0x2a   : > { %s1831_s28 = scalar_lea.vmem %s2332_s22, 256  ;;  %p1839_p5 = scmp.lt.s32.totalorder %s2332_s22, %s2332_s22 }
  0x2b   : > { %p1832_p13 = scmp.ne.s32.totalorder %s2332_s22, %s1831_s28  ;;  %p1840_p4 = scmp.lt.s32.totalorder %s1831_s28, %s1831_s28 }
  0x2d   : > { %p1834_p0 = pnand %p1832_p13, %p2359_p8  ;;  %p1841_p7 = por %p1840_p4, %p1839_p5 }
  0x2f   : > { %p1835_p2 = pneg %p1834_p0 }
  0x31   : > { %p1842_p9 = pnand %p1841_p7, %p1835_p2 }
  0x33   : > { %1845 = shalt.err (!%p1842_p9)
}
  0x34   : > { %s2223_s30 = smov 64   ;;  %s2224_s12 = smov 4  }
  0x35   : > { %1686 = dma.hbm_to_vmem [thread:$0]  (!%p2343_p6), %s2890_s3, 256, %s2332_s22, [#allocation9], %s2223_s30, %s2223_s30, %s2224_s12  }
  0x36   : > { %s2892_s5 = sld [smem:[#allocation35_spill]] }
  0x3c   : > { %s1846_s25 = scalar_lea.hbm %s2892_s5, 256 }
  0x3d   : > { %p1847_p4 = scmp.ne.s32.totalorder %s2892_s5, %s1846_s25  ;;  %p1853_p12 = scmp.lt.u32.totalorder %s1846_s25, %s2892_s5 }
  0x3f   : > { %p1849_p10 = pnand %p1847_p4, %p2359_p8 }
  0x41   : > { %p1850_p11 = pneg %p1849_p10 }
  0x43   : > { %p1855_p13 = pnand %p1853_p12, %p1850_p11 }
  0x45   : > { %1858 = shalt.err (!%p1855_p13)
}
  0x46   : > { %s1859_s22 = scalar_lea.vmem %s2347_s26, 256  ;;  %p1867_p7 = scmp.lt.s32.totalorder %s2347_s26, %s2347_s26 }
  0x47   : > { %p1860_p0 = scmp.ne.s32.totalorder %s2347_s26, %s1859_s22  ;;  %p1868_p9 = scmp.lt.s32.totalorder %s1859_s22, %s1859_s22 }
  0x49   : > { %p1862_p2 = pnand %p1860_p0, %p2359_p8  ;;  %p1869_p4 = por %p1868_p9, %p1867_p7 }
  0x4b   : > { %p1863_p5 = pneg %p1862_p2 }
  0x4d   : > { %p1870_p10 = pnand %p1869_p4, %p1863_p5 }
  0x4f   : > { %1873 = shalt.err (!%p1870_p10)
}
  0x50   : > { %1692 = dma.hbm_to_vmem [thread:$0]  (!%p2343_p6), %s2892_s5, 256, %s2347_s26, [#allocation12], %s2223_s30, %s2223_s30, %s2224_s12  }
  0x51   : > { %s2893_s7 = sld [smem:[#allocation36_spill]] }
  0x57   : > { %s1874_s14 = scalar_lea.hbm %s2893_s7, 256 }
  0x58   : > { %p1875_p11 = scmp.ne.s32.totalorder %s2893_s7, %s1874_s14  ;;  %p1881_p0 = scmp.lt.u32.totalorder %s1874_s14, %s2893_s7 }
  0x5a   : > { %p1877_p12 = pnand %p1875_p11, %p2359_p8 }
  0x5c   : > { %p1878_p13 = pneg %p1877_p12 }
  0x5e   : > { %p1883_p2 = pnand %p1881_p0, %p1878_p13 }
  0x60   : > { %1886 = shalt.err (!%p1883_p2)
}
  0x61   : > { %s1887_s26 = scalar_lea.vmem %s2349_s29, 256  ;;  %p1895_p4 = scmp.lt.s32.totalorder %s2349_s29, %s2349_s29 }
  0x62   : > { %p1888_p5 = scmp.ne.s32.totalorder %s2349_s29, %s1887_s26  ;;  %p1896_p10 = scmp.lt.s32.totalorder %s1887_s26, %s1887_s26 }
  0x64   : > { %p1890_p7 = pnand %p1888_p5, %p2359_p8  ;;  %p1897_p11 = por %p1896_p10, %p1895_p4 }
  0x66   : > { %p1891_p9 = pneg %p1890_p7 }
  0x68   : > { %p1898_p12 = pnand %p1897_p11, %p1891_p9 }
  0x6a   : > { %1901 = shalt.err (!%p1898_p12)
}
  0x6b   : > { %1698 = dma.hbm_to_vmem [thread:$0]  (!%p2343_p6), %s2893_s7, 256, %s2349_s29, [#allocation15], %s2223_s30, %s2223_s30, %s2224_s12  }
  0x6c   : > { %s2225_s11 = smov [#allocation17]   ;;  %s2894_s9 = sld [smem:[#allocation37_spill]] }
  0x6d   : > { %s396_s24 = sshll.u32 %s2225_s11, 4  ;;  %s397_s24 = int_to_ptr.vmem [resolvable:$true] %s396_s24 }
  0x72   : > { %s1902_s15 = scalar_lea.hbm %s2894_s9, 16 }
  0x73   : > { %p1903_p13 = scmp.ne.s32.totalorder %s2894_s9, %s1902_s15  ;;  %p1909_p5 = scmp.lt.u32.totalorder %s1902_s15, %s2894_s9 }
  0x75   : > { %p1905_p0 = pnand %p1903_p13, %p2359_p8 }
  0x77   : > { %p1906_p2 = pneg %p1905_p0 }
  0x79   : > { %p1911_p7 = pnand %p1909_p5, %p1906_p2 }
  0x7b   : > { %1914 = shalt.err (!%p1911_p7)
}
  0x7c   : > { %s1915_s29 = scalar_lea.vmem %s397_s24, 16  ;;  %s1922_s30 = scalar_lea.vmem %s397_s24, 32 }
  0x7d   : > { %p1916_p9 = scmp.ne.s32.totalorder %s397_s24, %s1915_s29  ;;  %p1923_p11 = scmp.lt.s32.totalorder %s397_s24, %s397_s24 }
  0x7e   : > { %p1924_p12 = scmp.lt.s32.totalorder %s1922_s30, %s1915_s29 }
  0x7f   : > { %p1918_p4 = pnand %p1916_p9, %p2359_p8 }
  0x80   : > { %p1925_p1 = por %p1924_p12, %p1923_p11 }
  0x81   : > { %p1919_p10 = pneg %p1918_p4 }
  0x83   : > { %p1926_p3 = pnand %p1925_p1, %p1919_p10 }
  0x85   : > { %1929 = shalt.err (!%p1926_p3)
}
  0x86   : > { %1704 = dma.hbm_to_vmem [thread:$0]  (!%p2343_p6), %s2894_s9, 16, %s397_s24, [#allocation18]  }
  0x87   : > { %s1490_s2 = sadd.s32 4294967294, %s2218_s20   ;;  %s2455_s11 = sadd.s32 1, %s2218_s20  }
  0x88   : > { %2895 = sst [smem:[#allocation30_spill]] %s2455_s11  ;;  %s38_s13 = ssub.s32 %s2218_s20, %s2455_s11 }
  0x89   : > { %s41_s14 = sadd.s32 1, %s2214_s19  ;;  %p39_p1 = scmp.eq.s32.totalorder %s38_s13, 0 }
  0x8a   : > { %p48_p3 = scmp.ne.s32.totalorder %s2214_s19, %s2210_s18  ;;  %p49_p13 = scmp.eq.s32.totalorder %s2218_s20, 0 }
  0x8b   : > { %p54_p0 = scmp.ne.s32.totalorder %s2210_s18, %s2206_s17  ;;  %p2897_p5 = scmp.eq.s32.totalorder %s2327_s23, 0 }
  0x8c   : > { %s2466_s15 = scalar_select %p39_p1, %s2214_s19, %s41_s14  }
  0x8d   : > { %p50_p2 = por %p49_p13, %p48_p3  ;;  %p2470_p7 = por %p2897_p5, %p54_p0 }
  0x8e   : > { %2896 = sst [smem:[#allocation31_spill]] %s2466_s15  ;;  %p298_p9 = scmp.eq.s32.totalorder %s2327_s23, 1 }
  0x8f   : > { %s2898_s21 = scalar_select %p2470_p7, 1, 0 }
  0x90   : > { %p304_p4 = scmp.eq.s32.totalorder %s1490_s2, 1  ;;  %p1730_p10 = scmp.lt.s32.totalorder %s2218_s20, 2 }
  0x91   : > { %s2477_s24 = sand.u32 1, %s2214_s19   ;;  %p2479_p11 = por %p298_p9, %p48_p3 }
  0x92   : > { %p2483_p12 = por %p304_p4, %p54_p0  ;;  %s2864_s26 = sshll.u32 %s2477_s24, 3 }
  0x93   : > { %s2899_s25 = scalar_select %p2479_p11, 1, 0 }
  0x94   : > { %s2900_s28 = scalar_select %p2483_p12, 1, 0 }
  0x95   : > { %s2865_s29 = sshll.u32 %s2218_s20, 7  ;;  %p2489_p1 = pnand %p1730_p10, %p50_p2 }
  0x96   : > { %s436_s12 = sand.u32 1, %s2218_s20   ;;  %s2902_s1 = sld [smem:[#allocation32_spill]] }
  0x97   : > { %s2901_s30 = scalar_select %p2489_p1, 1, 0 }
  0x98   : > { %s440_s14 = scalar_lea.vmem [#allocation5], %s2864_s26  ;;  %s2226_s5 = smov [#allocation10]  }
  0x99   : > { %s447_s3 = sshll.u32 %s440_s14, 4  ;;  %s2505_s7 = sshll.u32 %s2226_s5, 4  ;;  %s2503_s3 = int_to_ptr.vmem [resolvable:$true] %s447_s3  ;;  %s338_s7 = int_to_ptr.vmem [resolvable:$true] %s2505_s7 }
  0x9a   : > { %s2507_s9 = scalar_lea.sflag [#allocation6], %s436_s12  ;;  %p2513_p13 = pneg %p2489_p1 }
  0x9c   : > { %s2499_s13 = scalar_lea.hbm %s2902_s1, %s2865_s29  ;;  %s1935_s26 = scalar_lea.hbm %s2902_s1, 256 }
  0x9d   : > { %s1930_s15 = scalar_lea.hbm %s2499_s13, 128  ;;  %p1936_p5 = scmp.lt.u32.totalorder %s2499_s13, %s2902_s1 }
  0x9e   : > { %p1931_p3 = scmp.ne.s32.totalorder %s2499_s13, %s1930_s15  ;;  %p1937_p9 = scmp.lt.u32.totalorder %s1935_s26, %s1930_s15 }
  0x9f   : > { %s2903_s22 = scalar_select %p2513_p13, 1, 0 }
  0xa0   : > { %p1933_p0 = pnand %p2513_p13, %p1931_p3  ;;  %p1938_p4 = por %p1937_p9, %p1936_p5 }
  0xa1   : > { %p1939_p10 = scmp.lt.u32.totalorder %s1930_s15, %s2499_s13 }
  0xa2   : > { %p1934_p2 = pneg %p1933_p0 }
  0xa3   : > { %p1940_p12 = por %p1939_p10, %p1938_p4 }
  0xa5   : > { %p1941_p11 = pnand %p1940_p12, %p1934_p2 }
  0xa7   : > { %1944 = shalt.err (!%p1941_p11)
}
  0xa8   : > { %s1945_s12 = scalar_lea.vmem %s2503_s3, 128  ;;  %s2227_s2 = smov [#allocation5]  }
  0xa9   : > { %p1946_p3 = scmp.ne.s32.totalorder %s2503_s3, %s1945_s12  ;;  %s1950_s14 = sshll.u32 %s2227_s2, 4  ;;  %s1951_s14 = int_to_ptr.vmem [resolvable:$false] %s1950_s14 }
  0xaa   : > { %s1952_s29 = scalar_lea.vmem %s1951_s14, 256  ;;  %p1953_p6 = scmp.lt.s32.totalorder %s2503_s3, %s1951_s14 }
  0xab   : > { %p1948_p0 = pnand %p1946_p3, %p2513_p13  ;;  %p1954_p8 = scmp.lt.s32.totalorder %s1952_s29, %s1945_s12 }
  0xad   : > { %p1949_p7 = pneg %p1948_p0  ;;  %p1955_p5 = por %p1954_p8, %p1953_p6 }
  0xaf   : > { %p1956_p9 = pnand %p1955_p5, %p1949_p7 }
  0xb1   : > { %1959 = shalt.err (!%p1956_p9)
}
  0xb2   : > { %1714 = dma.hbm_to_vmem [thread:$0]  (!%p2489_p1), %s2499_s13, 128, %s2503_s3, %s2507_s9  }
  0xb3   : > { %s1960_s5 = scalar_lea.hbm %s2851_s4, 16  ;;  %p2904_p6 = scmp.ne.s32.totalorder %s2891_s16, 0 }
  0xb4   : > { %p1961_p11 = scmp.ne.s32.totalorder %s2851_s4, %s1960_s5  ;;  %p1967_p12 = scmp.lt.u32.totalorder %s1960_s5, %s2851_s4 }
  0xb6   : > { %p1963_p8 = pnand %p1961_p11, %p2904_p6 }
  0xb8   : > { %p1964_p7 = pneg %p1963_p8 }
  0xba   : > { %p1969_p2 = pnand %p1967_p12, %p1964_p7 }
  0xbc   : > { %1972 = shalt.err (!%p1969_p2)
}
  0xbd   : > { %s1973_s29 = scalar_lea.vmem %s338_s7, 16  ;;  %s1980_s3 = scalar_lea.vmem %s338_s7, 32 }
  0xbe   : > { %p1974_p4 = scmp.ne.s32.totalorder %s338_s7, %s1973_s29  ;;  %p1981_p0 = scmp.lt.s32.totalorder %s338_s7, %s338_s7 }
  0xbf   : > { %p1982_p5 = scmp.lt.s32.totalorder %s1980_s3, %s1973_s29 }
  0xc0   : > { %p1976_p10 = pnand %p1974_p4, %p2904_p6 }
  0xc1   : > { %p1983_p9 = por %p1982_p5, %p1981_p0 }
  0xc2   : > { %p1977_p3 = pneg %p1976_p10 }
  0xc4   : > { %p1984_p1 = pnand %p1983_p9, %p1977_p3 }
  0xc6   : > { %1987 = shalt.err (!%p1984_p1)
}
  0xc7   : > { %p2905_p11 = scmp.ne.s32.totalorder %s2889_s27, 0  ;;  %s2228_s15 = smov [#allocation13]  }
  0xc8   : > { %s361_s26 = sshll.u32 %s2228_s15, 4  ;;  %s2229_s5 = smov [#allocation16]   ;;  %s362_s26 = int_to_ptr.vmem [resolvable:$true] %s361_s26 }
  0xc9   : > { %1689 = dma.hbm_to_vmem [thread:$0]  (!%p2905_p11), %s2851_s4, 16, %s338_s7, [#allocation9]  }
  0xca   : > { %s385_s2 = sshll.u32 %s2229_s5, 4  ;;  %s1988_s19 = scalar_lea.hbm %s2853_s6, 16  ;;  %s386_s2 = int_to_ptr.vmem [resolvable:$true] %s385_s2 }
  0xcb   : > { %p1989_p1 = scmp.ne.s32.totalorder %s2853_s6, %s1988_s19  ;;  %p1995_p12 = scmp.lt.u32.totalorder %s1988_s19, %s2853_s6 }
  0xcd   : > { %p1991_p8 = pnand %p1989_p1, %p2904_p6 }
  0xcf   : > { %p1992_p7 = pneg %p1991_p8 }
  0xd1   : > { %p1997_p2 = pnand %p1995_p12, %p1992_p7 }
  0xd3   : > { %2000 = shalt.err (!%p1997_p2)
}
  0xd4   : > { %s2001_s7 = scalar_lea.vmem %s362_s26, 16  ;;  %s2008_s13 = scalar_lea.vmem %s362_s26, 32 }
  0xd5   : > { %p2002_p4 = scmp.ne.s32.totalorder %s362_s26, %s2001_s7  ;;  %p2009_p0 = scmp.lt.s32.totalorder %s362_s26, %s362_s26 }
  0xd6   : > { %p2010_p5 = scmp.lt.s32.totalorder %s2008_s13, %s2001_s7 }
  0xd7   : > { %p2004_p10 = pnand %p2002_p4, %p2904_p6 }
  0xd8   : > { %p2011_p9 = por %p2010_p5, %p2009_p0 }
  0xd9   : > { %p2005_p3 = pneg %p2004_p10 }
  0xdb   : > { %p2012_p13 = pnand %p2011_p9, %p2005_p3 }
  0xdd   : > { %2015 = shalt.err (!%p2012_p13)
}
  0xde   : > { %1695 = dma.hbm_to_vmem [thread:$0]  (!%p2905_p11), %s2853_s6, 16, %s362_s26, [#allocation12]  }
  0xdf   : > { %s2016_s12 = scalar_lea.hbm %s2855_s8, 16 }
  0xe0   : > { %p2017_p1 = scmp.ne.s32.totalorder %s2855_s8, %s2016_s12  ;;  %p2023_p13 = scmp.lt.u32.totalorder %s2016_s12, %s2855_s8 }
  0xe2   : > { %p2019_p8 = pnand %p2017_p1, %p2904_p6 }
  0xe4   : > { %p2020_p7 = pneg %p2019_p8 }
  0xe6   : > { %p2025_p12 = pnand %p2023_p13, %p2020_p7 }
  0xe8   : > { %2028 = shalt.err (!%p2025_p12)
}
  0xe9   : > { %s2029_s7 = scalar_lea.vmem %s386_s2, 16  ;;  %s2036_s26 = scalar_lea.vmem %s386_s2, 32 }
  0xea   : > { %p2030_p2 = scmp.ne.s32.totalorder %s386_s2, %s2029_s7  ;;  %p2037_p3 = scmp.lt.s32.totalorder %s386_s2, %s386_s2 }
  0xeb   : > { %p2038_p0 = scmp.lt.s32.totalorder %s2036_s26, %s2029_s7 }
  0xec   : > { %p2032_p4 = pnand %p2030_p2, %p2904_p6 }
  0xed   : > { %p2039_p5 = por %p2038_p0, %p2037_p3 }
  0xee   : > { %p2033_p10 = pneg %p2032_p4 }
  0xf0   : > { %p2040_p9 = pnand %p2039_p5, %p2033_p10 }
  0xf2   : > { %2043 = shalt.err (!%p2040_p9)
}
  0xf3   : > { %1701 = dma.hbm_to_vmem [thread:$0]  (!%p2905_p11), %s2855_s8, 16, %s386_s2, [#allocation15]  }
  0xf4   : > { %s2230_s5 = smov [#allocation19]   ;;  %s2044_s14 = scalar_lea.hbm %s2857_s10, 16 }
  0xf5   : > { %s407_s19 = sshll.u32 %s2230_s5, 4  ;;  %p2045_p1 = scmp.ne.s32.totalorder %s2857_s10, %s2044_s14  ;;  %s408_s19 = int_to_ptr.vmem [resolvable:$true] %s407_s19 }
  0xf6   : > { %p2051_p13 = scmp.lt.u32.totalorder %s2044_s14, %s2857_s10 }
  0xf7   : > { %p2047_p8 = pnand %p2045_p1, %p2904_p6 }
  0xf9   : > { %p2048_p7 = pneg %p2047_p8 }
  0xfb   : > { %p2053_p12 = pnand %p2051_p13, %p2048_p7 }
  0xfd   : > { %2056 = shalt.err (!%p2053_p12)
}
  0xfe   : > { %s2057_s2 = scalar_lea.vmem %s408_s19, 16  ;;  %s2064_s26 = scalar_lea.vmem %s408_s19, 32 }
  0xff   : > { %p2058_p2 = scmp.ne.s32.totalorder %s408_s19, %s2057_s2  ;;  %p2065_p3 = scmp.lt.s32.totalorder %s408_s19, %s408_s19 }
 0x100   : > { %p2066_p0 = scmp.lt.s32.totalorder %s2064_s26, %s2057_s2 }
 0x101   : > { %p2060_p4 = pnand %p2058_p2, %p2904_p6 }
 0x102   : > { %p2067_p5 = por %p2066_p0, %p2065_p3 }
 0x103   : > { %p2061_p10 = pneg %p2060_p4 }
 0x105   : > { %p2068_p9 = pnand %p2067_p5, %p2061_p10 }
 0x107   : > { %2071 = shalt.err (!%p2068_p9)
}
 0x108   : > { %1707 = dma.hbm_to_vmem [thread:$0]  (!%p2905_p11), %s2857_s10, 16, %s408_s19, [#allocation18]  }
 0x109   : > { %s2906_s16 = sshll.u32 %s2218_s20, 7  ;;  %s2907_s14 = sshll.u32 %s2477_s24, 3 }
 0x10a   : > { %s2615_s12 = scalar_lea.hbm %s2847_s0, %s2906_s16  ;;  %s422_s27 = scalar_lea.vmem [#allocation2], %s2907_s14 }
 0x10b   : > { %s429_s29 = sshll.u32 %s422_s27, 4  ;;  %s1505_s3 = sshll.u32 %s2477_s24, 1  ;;  %s2619_s29 = int_to_ptr.vmem [resolvable:$true] %s429_s29 }
 0x10c   : > { %s419_s1 = scalar_lea.sflag [#allocation3], %s2477_s24  ;;  %s2072_s7 = scalar_lea.hbm %s2615_s12, 128 }
 0x10d   : > { %p2073_p6 = scmp.ne.s32.totalorder %s2615_s12, %s2072_s7  ;;  %p2908_p11 = scmp.ne.s32.totalorder %s2903_s22, 0 }
 0x10e   : > { %s2077_s26 = scalar_lea.hbm %s2847_s0, 256  ;;  %p2078_p7 = scmp.lt.u32.totalorder %s2615_s12, %s2847_s0 }
 0x10f   : > { %p2075_p1 = pnand %p2073_p6, %p2908_p11  ;;  %p2079_p13 = scmp.lt.u32.totalorder %s2077_s26, %s2072_s7 }
 0x110   : > { %p2081_p2 = scmp.lt.u32.totalorder %s2072_s7, %s2615_s12 }
 0x111   : > { %p2076_p8 = pneg %p2075_p1  ;;  %p2080_p12 = por %p2079_p13, %p2078_p7 }
 0x113   : > { %p2082_p4 = por %p2081_p2, %p2080_p12 }
 0x115   : > { %p2083_p10 = pnand %p2082_p4, %p2076_p8 }
 0x117   : > { %2086 = shalt.err (!%p2083_p10)
}
 0x118   : > { %s2087_s16 = scalar_lea.vmem %s2619_s29, 128  ;;  %s2231_s5 = smov [#allocation2]  }
 0x119   : > { %p2088_p3 = scmp.ne.s32.totalorder %s2619_s29, %s2087_s16  ;;  %s2092_s11 = sshll.u32 %s2231_s5, 4  ;;  %s2093_s11 = int_to_ptr.vmem [resolvable:$false] %s2092_s11 }
 0x11a   : > { %s2094_s14 = scalar_lea.vmem %s2093_s11, 256  ;;  %p2095_p9 = scmp.lt.s32.totalorder %s2619_s29, %s2093_s11 }
 0x11b   : > { %p2090_p0 = pnand %p2088_p3, %p2908_p11  ;;  %p2096_p6 = scmp.lt.s32.totalorder %s2094_s14, %s2087_s16 }
 0x11d   : > { %p2091_p5 = pneg %p2090_p0  ;;  %p2097_p1 = por %p2096_p6, %p2095_p9 }
 0x11f   : > { %p2098_p7 = pnand %p2097_p1, %p2091_p5 }
 0x121   : > { %2101 = shalt.err (!%p2098_p7)
}
 0x122   : > { %p2909_p8 = scmp.ne.s32.totalorder %s2901_s30, 0  ;;  %s1506_s27 = sshll.u32 %s2218_s20, 5 }
 0x123   : > { %s2910_s2 = sld [smem:[#allocation33_spill]]  ;;  %s458_s13 = scalar_lea.vmem [#allocation7], %s1505_s3 }
 0x124   : > { %1711 = dma.hbm_to_vmem [thread:$0]  (!%p2909_p8), %s2615_s12, 128, %s2619_s29, %s419_s1  }
 0x125   : > { %s465_s15 = sshll.u32 %s458_s13, 4  ;;  %s466_s15 = int_to_ptr.vmem [resolvable:$true] %s465_s15 }
 0x129   : > { %s2648_s26 = scalar_lea.hbm %s2910_s2, %s1506_s27  ;;  %s2107_s1 = scalar_lea.hbm %s2910_s2, 64 }
 0x12a   : > { %s2102_s16 = scalar_lea.hbm %s2648_s26, 32  ;;  %p2108_p4 = scmp.lt.u32.totalorder %s2648_s26, %s2910_s2 }
 0x12b   : > { %p2103_p13 = scmp.ne.s32.totalorder %s2648_s26, %s2102_s16  ;;  %p2109_p10 = scmp.lt.u32.totalorder %s2107_s1, %s2102_s16 }
 0x12c   : > { %p2111_p0 = scmp.lt.u32.totalorder %s2102_s16, %s2648_s26 }
 0x12d   : > { %p2105_p12 = pnand %p2103_p13, %p2908_p11  ;;  %p2110_p3 = por %p2109_p10, %p2108_p4 }
 0x12f   : > { %p2106_p2 = pneg %p2105_p12  ;;  %p2112_p5 = por %p2111_p0, %p2110_p3 }
 0x131   : > { %p2113_p9 = pnand %p2112_p5, %p2106_p2 }
 0x133   : > { %2116 = shalt.err (!%p2113_p9)
}
 0x134   : > { %s2117_s24 = scalar_lea.vmem %s466_s15, 32  ;;  %s2232_s3 = smov [#allocation7]  }
 0x135   : > { %p2118_p6 = scmp.ne.s32.totalorder %s466_s15, %s2117_s24  ;;  %s2122_s14 = sshll.u32 %s2232_s3, 4  ;;  %s2123_s14 = int_to_ptr.vmem [resolvable:$false] %s2122_s14 }
 0x136   : > { %s2124_s27 = scalar_lea.vmem %s2123_s14, 64  ;;  %p2125_p13 = scmp.lt.s32.totalorder %s466_s15, %s2123_s14 }
 0x137   : > { %p2120_p1 = pnand %p2118_p6, %p2908_p11  ;;  %p2126_p12 = scmp.lt.s32.totalorder %s2124_s27, %s2117_s24 }
 0x139   : > { %p2121_p7 = pneg %p2120_p1  ;;  %p2127_p8 = por %p2126_p12, %p2125_p13 }
 0x13b   : > { %p2128_p4 = pnand %p2127_p8, %p2121_p7 }
 0x13d   : > { %2131 = shalt.err (!%p2128_p4)
}
 0x13e   : > { %p2911_p10 = scmp.ne.s32.totalorder %s2901_s30, 0  ;;  %s2912_s7 = sld [smem:[#allocation29_spill]] }
 0x140   : > { %1717 = dma.hbm_to_vmem [thread:$0]  (!%p2911_p10), %s2648_s26, 32, %s466_s15, %s2507_s9  }
 0x144   : > { %p2913_p2 = scmp.ne.s32.totalorder %s2912_s7, 0 }
 0x145   : > { %s2673_s22 = sand.u32 (!%p2913_p2), 1, %s2210_s18   ;;  %p2914_p11 = scmp.ne.s32.totalorder (!%p2913_p2), %s2898_s21, 0 }
 0x146   : > { %474 = sbr.rel (%p2913_p2) target bundleno = 2128 (0x850), region = 64  ;;  %s2676_s19 = sshll.u32 (!%p2913_p2), %s2673_s22, 3 }
 0x147   : > { %s477_s13 = scalar_lea.sflag (!%p2913_p2), [#allocation3], %s2673_s22  ;;  %s480_s16 = scalar_lea.vmem (!%p2913_p2), [#allocation2], %s2676_s19 }
 0x14d   : > { %2177 = dma.done.wait (%p2914_p11), %s477_s13, 128  }
 0x14e   : > { %2179 = vsyncadd (%p2914_p11), %s477_s13, 4294967168  ;;  %s485_s9 = sand.u32 1, %s2327_s23   ;;  %s489_s26 = scalar_lea.vmem [#allocation5], %s2676_s19 }
 0x14f   : > { %s486_s30 = scalar_lea.sflag [#allocation6], %s485_s9 }
 0x150   : > { %2181 = dma.done.wait (%p2914_p11), %s486_s30, 160  }
 0x151   : > { %2183 = vsyncadd (%p2914_p11), %s486_s30, 4294967136  ;;  %s1510_s15 = sshll.u32 %s2673_s22, 1  ;;  %p2915_p8 = scmp.eq.s32.totalorder %s2327_s23, 0 }
 0x152   : > { %s2691_s12 = scalar_lea.vmem [#allocation7], %s1510_s15 }
 0x153   : > { %2185 = dma.done.wait (%p2915_p8), [#allocation9], 272   ;;  %p2916_p3 = pmov %p2915_p8 }
 0x155   : > { %2187 = vsyncadd (%p2916_p3), [#allocation9], 4294967024  ;;  %p2917_p0 = pmov %p2916_p3 }
 0x157   : > { %2189 = dma.done.wait (%p2917_p0), [#allocation12], 272   ;;  %p2918_p5 = pmov %p2917_p0 }
 0x158   : > { %p2919_p9 = pmov %p2917_p0 }
 0x159   : > { %2191 = vsyncadd (%p2918_p5), [#allocation12], 4294967024 }
 0x15a   : > { %2193 = dma.done.wait (%p2919_p9), [#allocation15], 272   ;;  %p2920_p6 = pmov %p2917_p0 }
 0x15b   : > { %p2921_p1 = pmov %p2917_p0 }
 0x15c   : > { %2195 = vsyncadd (%p2920_p6), [#allocation15], 4294967024 }
 0x15d   : > { %2197 = dma.done.wait (%p2921_p1), [#allocation18], 32   ;;  %p2922_p7 = pmov %p2917_p0 }
 0x15e   : > { %v2233_v0 = vmov 0.0   ;;  %vm2234_vm0 = vmmov 0   ;;  %v1794_v1 = vld [vmem:[#allocation11] sm:$0xff]   ;;  %v1795_v2 = vld [vmem:[#allocation8] sm:$0xff]   ;;  %v1797_v5 = vld [vmem:[#allocation8 + $0x8] sm:$0xff]   ;;  %vm610_vm1 = vcmask 261120  }
 0x15f   : > { %2199 = vsyncadd (%p2922_p7), [#allocation18], 4294967264  ;;  %1579 = vmatprep.subr.bf16.mxu1 %v2233_v0  ;;  %1571 = vmatprep.subr.bf16.mxu0 %v2233_v0  ;;  %v1796_v3 = vld [vmem:[#allocation11 + $0x8] sm:$0xff]   ;;  %v1524_v9 = vld [vmem:[#allocation13] ss:$0 sm:$0xff]  ;;  %vm723_vm2 = vcmask 64512  }
 0x160   : > { %1583 = vmatprep.mubr.msk.bf16.mxu1 %vm2234_vm0, %v2233_v0  ;;  %1575 = vmatprep.mubr.msk.bf16.mxu0 %vm2234_vm0, %v2233_v0  ;;  %v581_v4 = vld [vmem:[%s489_s26] sm:$0xff]  ;;  %v2719_v6 = vld [vmem:[%s480_s16] sm:$0xff]  ;;  %s2235_s21 = smov 112   ;;  %s2236_s29 = smov 120   ;;  %vm790_vm4 = vcmask 1043456   ;;  %vm1184_vm5 = vcmask 130048  }
 0x161   : > { %1580 = vmatpush3.bf16.msra.mxu1 %v1794_v1  ;;  %1572 = vmatpush3.bf16.msra.mxu0 %v1795_v2  ;;  %v654_v7 = vpack.c.bf16 %v581_v4, %v581_v4  ;;  %v586_v8 = vpack.c.bf16 %v2719_v6, %v2719_v6  ;;  %v1520_v10 = vld [vmem:[#allocation10] ss:$0 sm:$0xff]  ;;  %s2237_s1 = smov 104   ;;  %v582_v33 = vld [vmem:[%s2691_s12] sm:$0x3]  ;;  %s2238_s5 = smov 96  }
 0x162   : > { %1581 = vmatprep.subr.bf16.mxu1 %v2233_v0  ;;  %1573 = vmatprep.subr.bf16.mxu0 %v2233_v0  ;;  %v583_v34 = vunpack.c.0.s8 %v582_v33  ;;  %s2239_s11 = smov 80   ;;  %s2240_s24 = smov 72   ;;  %vm1186_vm6 = vcmask 195584  }
 0x163   : > { %s2241_s3 = smov 88   ;;  %s2242_s14 = smov 8  }
 0x164   : > { %v584_v35 = vcvt.s32.f32 %v583_v34  ;;  %s2243_s27 = smov 16   ;;  %s2244_s7 = smov 24  }
 0x165   : > { %1582 = vmatpush3.bf16.msra.mxu1 %v1796_v3  ;;  %1574 = vmatpush3.bf16.msra.mxu0 %v1797_v5  ;;  %s1543_s13 = sshll.u32 %s2327_s23, 7  ;;  %s578_s16 = scalar_lea.vmem [#allocation20], %s2676_s19 }
 0x166   : > { %1593 = vmatprep.subr.bf16.mxu1 %v2233_v0  ;;  %1587 = vmatprep.subr.bf16.mxu0 %v2233_v0  ;;  %vm585_vm3 = vcmp.gt.f32.partialorder %v584_v35, 0.0  ;;  %s1301_s9 = sshll.u32 %s578_s16, 4  ;;  %s2923_s15 = sld [smem:[#allocation38_spill]]  ;;  %s2804_s9 = int_to_ptr.vmem [resolvable:$true] %s1301_s9 }
 0x167   : > { %p2924_p12 = scmp.ne.s32.totalorder %s2899_s25, 0  ;;  %s2245_s23 = smov [#allocation20]  }
 0x168   : > { %1584 = vmatmul.mubr.msk.bf16.vlgmr.msra.gmra.mrb[0].mxu1 %vm610_vm1, %v654_v7  ;;  %1576 = vmatmul.mubr.msk.bf16.vlgmr.msra.gmra.mrb[0].mxu0 %vm610_vm1, %v586_v8  ;;  %s2136_s19 = sshll.u32 %s2245_s23, 4  ;;  %s2137_s19 = int_to_ptr.vmem [resolvable:$false] %s2136_s19 }
 0x169   : > { %1595 = vmatprep.mubr.msk.bf16.mxu1 %vm2234_vm0, %v2233_v0  ;;  %1589 = vmatprep.mubr.msk.bf16.mxu0 %vm2234_vm0, %v2233_v0  ;;  %p2139_p2 = scmp.lt.s32.totalorder %s2804_s9, %s2137_s19 }
 0x16c   : > { %s2802_s12 = scalar_lea.hbm %s2923_s15, %s1543_s13 }
 0x23b   : > { %v715_v11 = vpop.f32.mrb[0].mxu1  ;;  %v648_v14 = vpop.f32.mrb[0].mxu0 }
 0x23c   : > { %v716_v12 = vadd.f32 %v1524_v9, %v715_v11  ;;  %v1585_v13 = vpop.f32.mrb[1].mxu1  ;;  %v649_v16 = vadd.f32 %v1520_v10, %v648_v14  ;;  %v1577_v17 = vpop.f32.mrb[1].mxu0 }
 0x23d   : > { %v718_v15 = vpop.f32.mrb[2].mxu1  ;;  %v651_v20 = vpop.f32.mrb[2].mxu0 }
 0x23e   : > { %v2731_v18 = vpack.c.bf16 %v716_v12, %v716_v12  ;;  %v1586_v19 = vpop.f32.mrb[3].mxu1  ;;  %v1578_v21 = vpop.f32.mrb[3].mxu0  ;;  %v721_v22 = vpack.c.bf16 %v649_v16, %v649_v16 }
 0x240   : > { %949 = vrot.lane.b32.xlu1 %v2731_v18, %s2235_s21  ;;  %837 = vrot.lane.b32.xlu0 %v2731_v18, %s2236_s29  ;;  %v728_v23 = vsel %vm723_vm2, %v2731_v18, 0 }
 0x241   : > { %1588 = vmatpush3.bf16.xpose.msra.mxu0 %v728_v23 }
 0x242   : > { %1599 = vmatprep.subr.bf16.mxu0 %v2233_v0 }
 0x244   : > { %947 = vrot.lane.b32.xlu1 %v721_v22, %s2235_s21  ;;  %835 = vrot.lane.b32.xlu0 %v721_v22, %s2236_s29  ;;  %s1288_s21 = scalar_lea.sflag [#allocation4], %s2673_s22  ;;  %s2132_s29 = scalar_lea.vmem %s2804_s9, 128 }
 0x245   : > { %p2133_p13 = scmp.ne.s32.totalorder %s2804_s9, %s2132_s29 }
 0x247   : > { %p2134_p4 = pnand %p2133_p13, %p2924_p12 }
 0x248   : > { %1059 = vrot.lane.b32.xlu1 %v721_v22, %s2237_s1  ;;  %1061 = vrot.lane.b32.xlu0 %v2731_v18, %s2237_s1  ;;  %s2138_s1 = scalar_lea.vmem %s2137_s19, 256 }
 0x249   : > { %1590 = vmatmul.mubr.msk.bf16.vlgmr.msra.gmra.mrb[4].mxu0 %vm723_vm2, %v721_v22  ;;  %p2135_p10 = pneg %p2134_p4  ;;  %p2140_p11 = scmp.lt.s32.totalorder %s2138_s1, %s2132_s29 }
 0x24a   : > { %1601 = vmatprep.mubr.msk.bf16.mxu0 %vm2234_vm0, %v2233_v0 }
 0x24b   : > { %p2141_p8 = por %p2140_p11, %p2139_p2 }
 0x24d   : > { %p2142_p3 = pnand %p2141_p8, %p2135_p10 }
 0x2b2   : > { %v838_v24 = vpop.permute.xlu0 %837  ;;  %v950_v26 = vpop.permute.xlu1 %949 }
 0x2b3   : > { %v843_v25 = vsel %vm723_vm2, %v838_v24, 0  ;;  %v955_v28 = vsel %vm723_vm2, %v950_v26, 0 }
 0x2b4   : > { %1600 = vmatpush3.bf16.xpose.msra.mxu0 %v843_v25 }
 0x2b5   : > { %1611 = vmatprep.subr.bf16.mxu0 %v2233_v0 }
 0x2b6   : > { %v836_v27 = vpop.permute.xlu0 %835  ;;  %v948_v30 = vpop.permute.xlu1 %947 }
 0x2ba   : > { %v1062_v29 = vpop.permute.xlu0 %1061  ;;  %v1060_v32 = vpop.permute.xlu1 %1059 }
 0x2bb   : > { %1602 = vmatmul.mubr.msk.bf16.vlgmr.msra.gmra.mrb[8].mxu0 %vm723_vm2, %v836_v27  ;;  %v1067_v31 = vsel %vm723_vm2, %v1062_v29, 0 }
 0x2bc   : > { %1612 = vmatpush3.bf16.xpose.msra.mxu0 %v955_v28  ;;  %1613 = vmatprep.mubr.msk.bf16.mxu0 %vm2234_vm0, %v2233_v0 }
 0x2bd   : > { %1623 = vmatprep.subr.bf16.mxu0 %v2233_v0 }
 0x2c3   : > { %1614 = vmatmul.mubr.msk.bf16.vlgmr.msra.gmra.mrb[12].mxu0 %vm723_vm2, %v948_v30 }
 0x2c4   : > { %1624 = vmatpush3.bf16.xpose.msra.mxu0 %v1067_v31  ;;  %1625 = vmatprep.mubr.msk.bf16.mxu0 %vm2234_vm0, %v2233_v0 }
 0x2c5   : > { %1635 = vmatprep.subr.bf16.mxu0 %v2233_v0 }
 0x2cb   : > { %1626 = vmatmul.mubr.msk.bf16.vlgmr.msra.gmra.mrb[16].mxu0 %vm723_vm2, %v1060_v32 }
 0x2cc   : > { %1639 = vmatprep.mubr.msk.bf16.mxu0 %vm2234_vm0, %v2233_v0 }
 0x31c   : > { %v764_v36 = vpop.f32.mrb[4].mxu0 }
 0x31d   : > { %v770_v37 = vmul.f32 0.35355338, %v764_v36  ;;  %v1591_v38 = vpop.f32.mrb[5].mxu0 }
 0x31e   : > { %v767_v39 = vpop.f32.mrb[6].mxu0 }
 0x31f   : > { %v1592_v40 = vpop.f32.mrb[7].mxu0  ;;  %v771_v41 = vsel %vm585_vm3, %v770_v37, -1e+09 }
 0x320   : > { %v772_v42 = vsel %vm723_vm2, %v771_v41, -inf }
 0x321   : > { %773 = vmax.xlane.f32.xlu0 %v772_v42 }
 0x38e   : > { %v879_v43 = vpop.f32.mrb[8].mxu0 }
 0x38f   : > { %v885_v44 = vmul.f32 0.35355338, %v879_v43  ;;  %v1603_v45 = vpop.f32.mrb[9].mxu0 }
 0x390   : > { %v882_v46 = vpop.f32.mrb[10].mxu0 }
 0x391   : > { %v1604_v47 = vpop.f32.mrb[11].mxu0  ;;  %v886_v48 = vsel %vm585_vm3, %v885_v44, -1e+09 }
 0x392   : > { %v887_v49 = vsel %vm723_vm2, %v886_v48, -inf }
 0x393   : > { %888 = vmax.xlane.f32.xlu1 %v887_v49 }
 0x396   : > { %v991_v50 = vpop.f32.mrb[12].mxu0 }
 0x397   : > { %v997_v51 = vmul.f32 0.35355338, %v991_v50  ;;  %v1615_v52 = vpop.f32.mrb[13].mxu0  ;;  %v1798_v50 = vld [vmem:[#allocation14] sm:$0xff]  }
 0x398   : > { %v994_v53 = vpop.f32.mrb[14].mxu0  ;;  %1636 = vmatpush3.bf16.msra.mxu0 %v1798_v50 }
 0x399   : > { %v1616_v54 = vpop.f32.mrb[15].mxu0  ;;  %v998_v55 = vsel %vm585_vm3, %v997_v51, -1e+09  ;;  %1637 = vmatprep.subr.bf16.mxu0 %v2233_v0 }
 0x39a   : > { %v999_v56 = vsel %vm723_vm2, %v998_v55, -inf }
 0x39b   : > { %1000 = vmax.xlane.f32.xlu0 %v999_v56 }
 0x39e   : > { %v1103_v57 = vpop.f32.mrb[16].mxu0 }
 0x39f   : > { %v1109_v58 = vmul.f32 0.35355338, %v1103_v57  ;;  %v1627_v59 = vpop.f32.mrb[17].mxu0 }
 0x3a0   : > { %v1106_v60 = vpop.f32.mrb[18].mxu0 }
 0x3a1   : > { %v1628_v61 = vpop.f32.mrb[19].mxu0  ;;  %v1110_v62 = vsel %vm585_vm3, %v1109_v58, -1e+09 }
 0x3a2   : > { %v1111_v63 = vsel %vm723_vm2, %v1110_v62, -inf }
 0x3a3   : > { %1112 = vmax.xlane.f32.xlu0 %v1111_v63 }
 0x3ae   : > { %v774_v1 = vpop.xlane.xlu0 %773 }
 0x3af   : > { %v775_v2 = vsub.f32 %v771_v41, %v774_v1 }
 0x3b1   : > { %v776_v3 = vmul.f32 1.442695, %v775_v2 }
 0x3b3   : > { %1800 = vpow2.f32 %v776_v3 }
 0x3bd   : > { %v1801_v4 = vpop.eup %1800 }
 0x3be   : > { %v778_v5 = vsel %vm723_vm2, %v1801_v4, 0.0 }
 0x3bf   : > { %779 = vadd.xlane.f32.xlu1 %v778_v5 }
 0x3d0   : > { %785 = vrot.lane.b32.xlu1 %v2731_v18, %s2238_s5 }
 0x420   : > { %v889_v7 = vpop.xlane.xlu1 %888 }
 0x421   : > { %v890_v8 = vsub.f32 %v886_v48, %v889_v7 }
 0x423   : > { %v891_v9 = vmul.f32 1.442695, %v890_v8  ;;  %v1536_v8 = vld [vmem:[#allocation16] ss:$0 sm:$0xff] }
 0x425   : > { %1802 = vpow2.f32 %v891_v9 }
 0x428   : > { %v1001_v10 = vpop.xlane.xlu0 %1000 }
 0x429   : > { %v1002_v11 = vsub.f32 %v998_v55, %v1001_v10  ;;  %v1799_v55 = vld [vmem:[#allocation14 + $0x8] sm:$0xff]  }
 0x42a   : > { %1638 = vmatpush3.bf16.msra.mxu0 %v1799_v55 }
 0x42b   : > { %v1003_v12 = vmul.f32 1.442695, %v1002_v11 }
 0x42d   : > { %1804 = vpow2.f32 %v1003_v12 }
 0x42f   : > { %v1803_v13 = vpop.eup %1802 }
 0x430   : > { %v1113_v14 = vpop.xlane.xlu0 %1112  ;;  %v893_v15 = vsel %vm723_vm2, %v1803_v13, 0.0 }
 0x431   : > { %v1114_v16 = vsub.f32 %v1110_v62, %v1113_v14  ;;  %894 = vadd.xlane.f32.xlu0 %v893_v15 }
 0x433   : > { %v1115_v17 = vmul.f32 1.442695, %v1114_v16 }
 0x435   : > { %1806 = vpow2.f32 %v1115_v17 }
 0x437   : > { %v1805_v19 = vpop.eup %1804 }
 0x438   : > { %v1005_v20 = vsel %vm723_vm2, %v1805_v19, 0.0 }
 0x439   : > { %1006 = vadd.xlane.f32.xlu1 %v1005_v20 }
 0x43f   : > { %v1807_v21 = vpop.eup %1806 }
 0x440   : > { %v1117_v22 = vsel %vm723_vm2, %v1807_v21, 0.0 }
 0x441   : > { %1118 = vadd.xlane.f32.xlu0 %v1117_v22 }
 0x44a   : > { %1011 = vrot.lane.b32.xlu1 %v2731_v18, %s2239_s11 }
 0x44c   : > { %v780_v23 = vpop.xlane.xlu1 %779 }
 0x44d   : > { %1808 = vrcp.f32 %v780_v23 }
 0x44e   : > { %1123 = vrot.lane.b32.xlu1 %v2731_v18, %s2240_s24 }
 0x450   : > { %v786_v24 = vpop.permute.xlu1 %785 }
 0x451   : > { %v792_v25 = vsel %vm790_vm4, %v786_v24, 0 }
 0x452   : > { %1594 = vmatpush3.bf16.msra.mxu1 %v792_v25 }
 0x453   : > { %1605 = vmatprep.subr.bf16.mxu1 %v2233_v0 }
 0x457   : > { %v1809_v26 = vpop.eup %1808  ;;  %899 = vrot.lane.b32.xlu0 %v2731_v18, %s2241_s3 }
 0x458   : > { %v782_v27 = vmul.f32 %v1809_v26, %v1801_v4 }
 0x45a   : > { %v783_v28 = vpack.c.bf16 %v782_v27, %v782_v27  ;;  %v1541_v27 = vld [vmem:[#allocation19] ss:$0 sm:$0xff] }
 0x45c   : > { %1596 = vmatmul.mubr.msk.bf16.vlgmr.msra.gmra.mrb[4].mxu1 %vm723_vm2, %v783_v28 }
 0x45d   : > { %1607 = vmatprep.mubr.msk.bf16.mxu1 %vm2234_vm0, %v2233_v0 }
 0x4be   : > { %v895_v29 = vpop.xlane.xlu0 %894 }
 0x4bf   : > { %1810 = vrcp.f32 %v895_v29 }
 0x4c6   : > { %v1007_v30 = vpop.xlane.xlu1 %1006 }
 0x4c7   : > { %1812 = vrcp.f32 %v1007_v30 }
 0x4c9   : > { %v1811_v31 = vpop.eup %1810 }
 0x4ca   : > { %v897_v33 = vmul.f32 %v1811_v31, %v1803_v13  ;;  %v1012_v36 = vpop.permute.xlu1 %1011 }
 0x4cb   : > { %v1017_v38 = vsel %vm790_vm4, %v1012_v36, 0 }
 0x4cc   : > { %v898_v18 = vpack.c.bf16 %v897_v33, %v897_v33 }
 0x4ce   : > { %v1119_v32 = vpop.xlane.xlu0 %1118  ;;  %v1124_v40 = vpop.permute.xlu1 %1123 }
 0x4cf   : > { %1814 = vrcp.f32 %v1119_v32  ;;  %v1129_v43 = vsel %vm790_vm4, %v1124_v40, 0 }
 0x4d1   : > { %v1813_v37 = vpop.eup %1812 }
 0x4d2   : > { %v900_v34 = vpop.permute.xlu0 %899  ;;  %v1009_v39 = vmul.f32 %v1813_v37, %v1805_v19 }
 0x4d3   : > { %v905_v35 = vsel %vm790_vm4, %v900_v34, 0 }
 0x4d4   : > { %1606 = vmatpush3.bf16.msra.mxu1 %v905_v35  ;;  %v1010_v41 = vpack.c.bf16 %v1009_v39, %v1009_v39 }
 0x4d5   : > { %1617 = vmatprep.subr.bf16.mxu1 %v2233_v0 }
 0x4d7   : > { %1608 = vmatmul.mubr.msk.bf16.vlgmr.msra.gmra.mrb[8].mxu1 %vm723_vm2, %v898_v18 }
 0x4d8   : > { %1618 = vmatpush3.bf16.msra.mxu1 %v1017_v38  ;;  %1619 = vmatprep.mubr.msk.bf16.mxu1 %vm2234_vm0, %v2233_v0 }
 0x4d9   : > { %1629 = vmatprep.subr.bf16.mxu1 %v2233_v0  ;;  %v1815_v42 = vpop.eup %1814 }
 0x4da   : > { %v1121_v44 = vmul.f32 %v1815_v42, %v1807_v21 }
 0x4dc   : > { %v1122_v45 = vpack.c.bf16 %v1121_v44, %v1121_v44 }
 0x4df   : > { %1620 = vmatmul.mubr.msk.bf16.vlgmr.msra.gmra.mrb[12].mxu1 %vm723_vm2, %v1010_v41 }
 0x4e0   : > { %1630 = vmatpush3.bf16.msra.mxu1 %v1129_v43  ;;  %1631 = vmatprep.mubr.msk.bf16.mxu1 %vm2234_vm0, %v2233_v0 }
 0x4e7   : > { %1632 = vmatmul.mubr.msk.bf16.vlgmr.msra.gmra.mrb[16].mxu1 %vm723_vm2, %v1122_v45 }
 0x52f   : > { %v828_v46 = vpop.f32.mrb[4].mxu1 }
 0x530   : > { %v1597_v47 = vpop.f32.mrb[5].mxu1 }
 0x531   : > { %v831_v48 = vpop.f32.mrb[6].mxu1 }
 0x532   : > { %v1598_v49 = vpop.f32.mrb[7].mxu1 }
 0x5aa   : > { %v941_v51 = vpop.f32.mrb[8].mxu1 }
 0x5ab   : > { %1172 = vrot.lane.b32.xlu0 %v941_v51, %s2242_s14  ;;  %v1609_v52 = vpop.f32.mrb[9].mxu1 }
 0x5ac   : > { %v944_v53 = vpop.f32.mrb[10].mxu1 }
 0x5ad   : > { %v1610_v54 = vpop.f32.mrb[11].mxu1 }
 0x5b2   : > { %v1053_v56 = vpop.f32.mrb[12].mxu1 }
 0x5b3   : > { %1176 = vrot.lane.b32.xlu1 %v1053_v56, %s2243_s27  ;;  %v1621_v57 = vpop.f32.mrb[13].mxu1 }
 0x5b4   : > { %v1056_v58 = vpop.f32.mrb[14].mxu1 }
 0x5b5   : > { %v1622_v59 = vpop.f32.mrb[15].mxu1 }
 0x5ba   : > { %v1165_v60 = vpop.f32.mrb[16].mxu1 }
 0x5bb   : > { %1180 = vrot.lane.b32.xlu0 %v1165_v60, %s2244_s7  ;;  %v1633_v61 = vpop.f32.mrb[17].mxu1 }
 0x5bc   : > { %v1168_v62 = vpop.f32.mrb[18].mxu1 }
 0x5bd   : > { %v1634_v0 = vpop.f32.mrb[19].mxu1 }
 0x61d   : > { %v1173_v63 = vpop.permute.xlu0 %1172 }
 0x61e   : > { %v1183_v2 = vsel %vm723_vm2, %v828_v46, %v1173_v63 }
 0x625   : > { %v1177_v1 = vpop.permute.xlu1 %1176 }
 0x626   : > { %v1185_v3 = vsel %vm1184_vm5, %v1183_v2, %v1177_v1 }
 0x62d   : > { %v1181_v4 = vpop.permute.xlu0 %1180 }
 0x62e   : > { %v1187_v5 = vsel %vm1186_vm6, %v1185_v3, %v1181_v4 }
 0x62f   : > { %v1188_v7 = vpack.c.bf16 %v1187_v5, %v1187_v5 }
 0x631   : > { %1640 = vmatmul.mubr.msk.bf16.vlgmr.msra.gmra.mrb[20].mxu0 %vm610_vm1, %v1188_v7 }
 0x704   : > { %v1249_v9 = vpop.f32.mrb[20].mxu0 }
 0x705   : > { %v1250_v10 = vadd.f32 %v1536_v8, %v1249_v9  ;;  %v1641_v11 = vpop.f32.mrb[21].mxu0 }
 0x706   : > { %v1252_v12 = vpop.f32.mrb[22].mxu0 }
 0x707   : > { %v1642_v13 = vpop.f32.mrb[23].mxu0  ;;  %v1255_v14 = vadd.f32 %v1250_v10, %v2719_v6  ;;  %v1540_v6 = vld [vmem:[#allocation17] ss:$0 sm:$0xff] }
 0x709   : > { %v1256_v15 = vsel %vm610_vm1, %v1255_v14, 0.0 }
 0x70a   : > { %1257 = vadd.xlane.f32.xlu1 %v1256_v15 }
 0x797   : > { %v1258_v16 = vpop.xlane.xlu1 %1257 }
 0x798   : > { %v1260_v17 = vmul.f32 0.03125, %v1258_v16 }
 0x79a   : > { %v1261_v19 = vsub.f32 %v1255_v14, %v1260_v17 }
 0x79c   : > { %v1262_v20 = vmul.f32 %v1261_v19, %v1261_v19 }
 0x79e   : > { %v1263_v21 = vsel %vm610_vm1, %v1262_v20, 0.0 }
 0x79f   : > { %1264 = vadd.xlane.f32.xlu0 %v1263_v21 }
 0x82c   : > { %v1265_v22 = vpop.xlane.xlu0 %1264 }
 0x82d   : > { %v1266_v23 = vmul.f32 0.03125, %v1265_v22 }
 0x82f   : > { %v1267_v24 = vadd.f32 1e-12, %v1266_v23 }
 0x831   : > { %1816 = vrsqrt.f32 %v1267_v24 }
 0x83b   : > { %v1817_v25 = vpop.eup %1816 }
 0x83c   : > { %v1269_v26 = vmul.f32 %v1817_v25, %v1261_v19 }
 0x83e   : > { %v1277_v28 = vmul.f32 %v1540_v6, %v1269_v26 }
 0x840   : > { %v1285_v29 = vadd.f32 %v1541_v27, %v1277_v28 }
 0x842   : > { %1286 = vst.msk [vmem:[%s578_s16] sm:$0xff] %vm610_vm1, %v1285_v29 }
 0x843   : > { %2145 = shalt.err (!%p2142_p3)
}
 0x844   : > { %s2146_s22 = scalar_lea.hbm %s2802_s12, 128  ;;  %s2150_s24 = scalar_lea.hbm %s2923_s15, 256 }
 0x845   : > { %p2147_p0 = scmp.ne.s32.totalorder %s2802_s12, %s2146_s22  ;;  %p2151_p6 = scmp.lt.u32.totalorder %s2802_s12, %s2923_s15 }
 0x846   : > { %p2152_p1 = scmp.lt.u32.totalorder %s2150_s24, %s2146_s22  ;;  %p2154_p13 = scmp.lt.u32.totalorder %s2146_s22, %s2802_s12 }
 0x847   : > { %p2148_p5 = pnand %p2147_p0, %p2924_p12 }
 0x848   : > { %p2153_p7 = por %p2152_p1, %p2151_p6 }
 0x849   : > { %p2149_p9 = pneg %p2148_p5 }
 0x84a   : > { %p2155_p4 = por %p2154_p13, %p2153_p7 }
 0x84c   : > { %p2156_p10 = pnand %p2155_p4, %p2149_p9 }
 0x84e   : > { %2159 = shalt.err (!%p2156_p10)
}
 0x84f   : > { %1681 = dma.vmem_to_hbm [thread:$0]  (%p2924_p12), %s2804_s9, 128, %s2802_s12, %s1288_s21  }
 0x850 PF: > { %s1313_s27 = sand.u32 1, %s2206_s17   ;;  %p2925_p2 = scmp.ne.s32.totalorder %s2900_s28, 0 }
 0x851   : > { %p2926_p11 = scmp.ge.s32.totalorder %s2218_s20, 2  ;;  %s1314_s7 = scalar_lea.sflag [#allocation4], %s1313_s27 }
 0x853   : > { %p1719_p8 = pnand %p2926_p11, %p2925_p2 }
 0x855   : > { %2201 = dma.done.wait (!%p1719_p8), %s1314_s7, 128  }
 0x856   : > { %2203 = vsyncadd (!%p1719_p8), %s1314_s7, 4294967168  ;;  %s2927_s20 = sld [smem:[#allocation30_spill]]  ;;  %s2928_s13 = sld [smem:[#allocation28_spill]] }
 0x857   : > { %s2929_s19 = sld [smem:[#allocation31_spill]]  ;;  %s2930_s17 = smov %s2210_s18 }
 0x85c   : > { %p31_p3 = scmp.ge.s32.totalorder %s2927_s20, 4   ;;  %s2931_s18 = smov %s2928_s13 }
 0x85e   :  { %33 = sbr.rel (!%p31_p3) target bundleno = 19 (0x13), region = 165 }
 0x865   :  { %1319 = vsyncpa [#allocation3], 1 }
 0x866   :  { %1321 = vsyncpa [#allocation3 + $0x1], 1 }
 0x867   :  { %1322 = vsyncpa [#allocation6], 1 }
 0x868   :  { %1324 = vsyncpa [#allocation6 + $0x1], 1 }
 0x869   :  { %1325 = vsyncpa [#allocation9], 1 }
 0x86a   :  { %1326 = vsyncpa [#allocation12], 1 }
 0x86b   :  { %1327 = vsyncpa [#allocation15], 1 }
 0x86c   :  { %1328 = vsyncpa [#allocation18], 1 }
 0x86d   :  { %1329 = vsyncpa [#allocation4], 1 }
 0x86e   :  { %1331 = vsyncpa [#allocation4 + $0x1], 1 }

</bundles_post_ra>
